<compile_context>
chip_gen: v6e
topology: v6e:2x2x1
jax: 0.10.0
libtpu: 0.0.40
codegen_flags: <defaults>
</compile_context>

<pallas_src>
import functools

import jax
import jax.numpy as jnp
import numpy as np
from jax import lax
from jax.experimental import pallas as pl
from jax.experimental.pallas import tpu as pltpu


def _lstm_cell_kernel(x_ref, h0_ref, c0_ref, wcat_ref, whh_ref, b_ref,
                      s_ref, hseq_ref, hn_ref, cn_ref,
                      *, batch_p, seq_len, hidden_dim):
    """Whole-sequence kernel; everything VMEM-resident (shapes are tiny).

    Layout: rows are time-major flattened and batch-padded, row r = t*Bp + b.
      x_ref    (T*Bp, K)   bf16   K = 2E, or 2E+H when the sentinel gate uses h
      h0/c0    (Bp, H)     f32
      wcat     (K, 5H)     bf16   [W_ih^T | W_x^T] (+ [0 | W_h^T] rows)
      whh      (H, 4H)     bf16
      b        (1, 4H)     f32    b_ih + b_hh
      outputs: s (T*Bp,H) f32, h_seq (T*Bp,H) f32, h_n (Bp,H) f32, c_n (Bp,H) f32
    """
    Bp, T, H = batch_p, seq_len, hidden_dim
    mm_dtype = whh_ref.dtype

    x = x_ref[...]                                           # (T*Bp, K)

    # ---- Single fused input-side projection: LSTM input gates AND sentinel
    #      gate pre-activation in one MXU matmul over all T steps.
    proj = jnp.dot(x, wcat_ref[...],
                   preferred_element_type=jnp.float32)       # (T*Bp, 5H)
    gx_all = proj[:, :4 * H] + b_ref[...]                    # (T*Bp, 4H) f32
    gate = jax.nn.sigmoid(proj[:, 4 * H:5 * H])              # (T*Bp, H)  f32

    # ---- Serial LSTM recurrence.  Fully unrolled (T small & static) so the
    #      scheduler gets cross-step visibility; every slice is (8,128)-aligned
    #      because Bp is a multiple of 8.  Only h_prev @ W_hh is on the chain.
    h = h0_ref[...]                                          # (Bp, H) f32
    c = c0_ref[...]                                          # (Bp, H) f32
    hs = []
    for t in range(T):
        gates = gx_all[t * Bp:(t + 1) * Bp, :] + jnp.dot(
            h.astype(mm_dtype), whh_ref[...],
            preferred_element_type=jnp.float32)              # (Bp, 4H) f32
        # PyTorch gate order: i, f, g, o.
        i_g = jax.nn.sigmoid(gates[:, 0 * H:1 * H])
        f_g = jax.nn.sigmoid(gates[:, 1 * H:2 * H])
        g_g = jnp.tanh(gates[:, 2 * H:3 * H])
        o_g = jax.nn.sigmoid(gates[:, 3 * H:4 * H])
        c = f_g * c + i_g * g_g
        h = o_g * jnp.tanh(c)
        hs.append(h)                                         # buffered, no store here

    # Epilogue: full-tile, unmasked, lane-dense stores (off the serial chain).
    hseq_ref[...] = jnp.concatenate(hs, axis=0)              # (T*Bp, H)
    hn_ref[...] = h
    cn_ref[...] = c

    # s_t = g_t * tanh(c_n): final cell broadcast over all steps, one multiply
    # and one full-tile store.
    tanh_c = jnp.tanh(c)                                     # (Bp, H) f32
    s_ref[...] = gate * jnp.concatenate([tanh_c] * T, axis=0)


def lstm_cell_forward(x_t, states, params, h=None):
    """JAX/Pallas equivalent of LSTM_cell.forward.

    x_t:    (B, T, 2E) float32 (batch_first)
    states: (h0, c0), each (1, B, H)
    returns (s_t (B,T,H), h_t (B,T,H), (h_n (1,B,H), c_n (1,B,H)))
    """
    w_ih, w_hh, b_ih, b_hh, w_x, w_h = params
    B, T, E2 = x_t.shape
    H = w_hh.shape[1]
    h0, c0 = states

    mm_dtype = jnp.bfloat16   # MXU-native operands; gate/state math stays f32.

    # Pad batch to the f32 sublane granularity so all in-kernel per-step slices
    # and stores are (8,128)-tile aligned.
    SUB = 8
    Bp = ((B + SUB - 1) // SUB) * SUB
    pad_b = Bp - B

    # Single input transpose to time-major, batch-padded, flattened to
    # (T*Bp, 2E) so every batched matmul inside the kernel is one dense MXU op.
    x_tm = jnp.transpose(x_t, (1, 0, 2))                      # (T, B, 2E)
    if pad_b:
        x_tm = jnp.pad(x_tm, ((0, 0), (0, pad_b), (0, 0)))
    x_flat = x_tm.reshape(T * Bp, E2).astype(mm_dtype)

    has_hgate = h is not None
    wih_t = w_ih.T.astype(jnp.float32)                        # (2E, 4H)
    wx_t = w_x.T.astype(jnp.float32)                          # (2E, H)
    if has_hgate:
        # Fuse the sentinel-gate h term into the same matmul: LHS = [x | h],
        # RHS = [[W_ih^T | W_x^T], [0 | W_h^T]]  (K = 2E+H = full MXU depth on
        # v6e/v7x).  The zero block keeps the LSTM gate columns h-independent.
        h_tm = jnp.transpose(h, (1, 0, 2))                    # (T, B, H)
        if pad_b:
            h_tm = jnp.pad(h_tm, ((0, 0), (0, pad_b), (0, 0)))
        hg_flat = h_tm.reshape(T * Bp, H).astype(mm_dtype)
        x_cat = jnp.concatenate([x_flat, hg_flat], axis=1)    # (T*Bp, 2E+H)
        w_top = jnp.concatenate([wih_t, wx_t], axis=1)        # (2E, 5H)
        w_bot = jnp.concatenate(
            [jnp.zeros((H, 4 * H), jnp.float32), w_h.T.astype(jnp.float32)],
            axis=1)                                           # (H, 5H)
        w_cat = jnp.concatenate([w_top, w_bot], axis=0).astype(mm_dtype)
    else:
        # h defaults to zeros -> the W_h term vanishes; no zeros tensor built.
        x_cat = x_flat
        w_cat = jnp.concatenate([wih_t, wx_t], axis=1).astype(mm_dtype)

    whh_t = w_hh.T.astype(mm_dtype)                           # (H, 4H)
    bias = (b_ih + b_hh).reshape(1, 4 * H).astype(jnp.float32)

    h0p = h0[0].astype(jnp.float32)
    c0p = c0[0].astype(jnp.float32)
    if pad_b:
        h0p = jnp.pad(h0p, ((0, pad_b), (0, 0)))
        c0p = jnp.pad(c0p, ((0, pad_b), (0, 0)))

    K = x_cat.shape[1]
    kernel = functools.partial(_lstm_cell_kernel, batch_p=Bp, seq_len=T,
                               hidden_dim=H)
    vmem = pl.BlockSpec(memory_space=pltpu.MemorySpace.VMEM)
    out_shapes = (
        jax.ShapeDtypeStruct((T * Bp, H), jnp.float32),   # s     (time-major flat)
        jax.ShapeDtypeStruct((T * Bp, H), jnp.float32),   # h_seq (time-major flat)
        jax.ShapeDtypeStruct((Bp, H), jnp.float32),       # h_n
        jax.ShapeDtypeStruct((Bp, H), jnp.float32),       # c_n
    )

    # Advisory cost estimate so XLA schedules neighbouring ops around the call.
    flops = 2 * (T * Bp) * K * 5 * H + T * 2 * Bp * H * 4 * H
    transcendentals = 6 * T * Bp * H
    bytes_in = (x_cat.size * 2 + w_cat.size * 2 + whh_t.size * 2
                + bias.size * 4 + h0p.size * 4 + c0p.size * 4)
    bytes_out = (2 * T * Bp * H + 2 * Bp * H) * 4
    cost = pl.CostEstimate(flops=flops, transcendentals=transcendentals,
                           bytes_accessed=bytes_in + bytes_out)

    s_fl, hseq_fl, h_n, c_n = pl.pallas_call(
        kernel,
        out_shape=out_shapes,
        in_specs=[vmem] * 6,
        out_specs=(vmem, vmem, vmem, vmem),
        cost_estimate=cost,
    )(x_cat, h0p, c0p, w_cat, whh_t, bias)

    # Un-pad and restore batch-first layout (negligible at these shapes).
    s_t = jnp.transpose(s_fl.reshape(T, Bp, H)[:, :B, :], (1, 0, 2))
    h_seq = jnp.transpose(hseq_fl.reshape(T, Bp, H)[:, :B, :], (1, 0, 2))
    return s_t, h_seq, (h_n[:B][None], c_n[:B][None])


def reference_forward(x_t, states, params, h=None):
    """Pure-JAX f32 reference mirroring PyTorch nn.LSTM + gating semantics."""
    w_ih, w_hh, b_ih, b_hh, w_x, w_h = params
    B, T, _ = x_t.shape
    H = w_hh.shape[1]
    h0, c0 = states
    if h is None:
        h = jnp.zeros((B, T, H), x_t.dtype)

    def step(carry, x):
        h_prev, c_prev = carry
        gates = x @ w_ih.T + b_ih + h_prev @ w_hh.T + b_hh
        i = jax.nn.sigmoid(gates[:, :H])
        f = jax.nn.sigmoid(gates[:, H:2 * H])
        g = jnp.tanh(gates[:, 2 * H:3 * H])
        o = jax.nn.sigmoid(gates[:, 3 * H:])
        c = f * c_prev + i * g
        hh = o * jnp.tanh(c)
        return (hh, c), hh

    (h_n, c_n), h_seq = lax.scan(step, (h0[0], c0[0]),
                                 jnp.transpose(x_t, (1, 0, 2)))
    h_seq = jnp.transpose(h_seq, (1, 0, 2))
    g_t = jax.nn.sigmoid(x_t @ w_x.T + h @ w_h.T)
    s_t = g_t * jnp.tanh(c_n)[:, None, :]
    return s_t, h_seq, (h_n[None], c_n[None])


if __name__ == "__main__":
    key = jax.random.PRNGKey(0)
    B, T = 2, 8
    embed_dim = 64          # params.embed_dim
    hidden_dim = 128        # params.hidden_dim (128-aligned for lanes)
    E2 = embed_dim * 2
    H = hidden_dim

    ks = jax.random.split(key, 10)
    scale = 1.0 / float(np.sqrt(H))
    # Deterministic synthetic parameters (same shapes as nn.LSTM / nn.Linear).
    w_ih = jax.random.uniform(ks[0], (4 * H, E2), jnp.float32, -scale, scale)
    w_hh = jax.random.uniform(ks[1], (4 * H, H), jnp.float32, -scale, scale)
    b_ih = jax.random.uniform(ks[2], (4 * H,), jnp.float32, -scale, scale)
    b_hh = jax.random.uniform(ks[3], (4 * H,), jnp.float32, -scale, scale)
    w_x = jax.random.uniform(ks[4], (H, E2), jnp.float32, -scale, scale)
    w_h = jax.random.uniform(ks[5], (H, H), jnp.float32, -scale, scale)
    params = (w_ih, w_hh, b_ih, b_hh, w_x, w_h)

    x = jax.random.normal(ks[6], (B, T, E2), jnp.float32)
    h0 = jax.random.normal(ks[7], (1, B, H), jnp.float32)
    c0 = jax.random.normal(ks[8], (1, B, H), jnp.float32)

    # --- h=None path (the common / default branch) ---
    s_t, h_t, (h_n, c_n) = lstm_cell_forward(x, (h0, c0), params)
    jax.block_until_ready((s_t, h_t, h_n, c_n))

    s_r, h_r, (hn_r, cn_r) = reference_forward(x, (h0, c0), params)
    # bf16 MXU operands -> keep the loose tolerance.
    np.testing.assert_allclose(np.asarray(s_t), np.asarray(s_r), atol=2e-2, rtol=2e-2)
    np.testing.assert_allclose(np.asarray(h_t), np.asarray(h_r), atol=2e-2, rtol=2e-2)
    np.testing.assert_allclose(np.asarray(h_n), np.asarray(hn_r), atol=2e-2, rtol=2e-2)
    np.testing.assert_allclose(np.asarray(c_n), np.asarray(cn_r), atol=2e-2, rtol=2e-2)

    # --- explicit-h path (exercises the fused W_h sentinel-gate term) ---
    h_in = jax.random.normal(ks[9], (B, T, H), jnp.float32)
    s_t2, h_t2, _ = lstm_cell_forward(x, (h0, c0), params, h=h_in)
    jax.block_until_ready((s_t2, h_t2))
    s_r2, _, _ = reference_forward(x, (h0, c0), params, h=h_in)
    np.testing.assert_allclose(np.asarray(s_t2), np.asarray(s_r2), atol=2e-2, rtol=2e-2)

    print("KERNEL_OK")
</pallas_src>

<mosaic_0001>
module attributes {stable_mosaic.version = 11 : i64} {
  func.func @_lstm_cell_kernel(%arg0: memref<64x128xbf16, #tpu.memory_space<vmem>>, %arg1: memref<8x128xf32, #tpu.memory_space<vmem>>, %arg2: memref<8x128xf32, #tpu.memory_space<vmem>>, %arg3: memref<128x640xbf16, #tpu.memory_space<vmem>>, %arg4: memref<128x512xbf16, #tpu.memory_space<vmem>>, %arg5: memref<1x512xf32, #tpu.memory_space<vmem>>, %arg6: memref<64x128xf32, #tpu.memory_space<vmem>>, %arg7: memref<64x128xf32, #tpu.memory_space<vmem>>, %arg8: memref<8x128xf32, #tpu.memory_space<vmem>>, %arg9: memref<8x128xf32, #tpu.memory_space<vmem>>) attributes {dimension_semantics = [], scalar_prefetch = 0 : i64, scratch_operands = 0 : i64, tpu.core_type = #tpu.core_type<tc>} {
    %c0 = arith.constant 0 : index
    %c0_0 = arith.constant 0 : index
    %0 = vector.load %arg0[%c0, %c0_0] : memref<64x128xbf16, #tpu.memory_space<vmem>>, vector<64x128xbf16>
    %c0_1 = arith.constant 0 : index
    %c0_2 = arith.constant 0 : index
    %1 = vector.load %arg3[%c0_1, %c0_2] : memref<128x640xbf16, #tpu.memory_space<vmem>>, vector<128x640xbf16>
    %cst = arith.constant dense<0.000000e+00> : vector<64x640xf32>
    %2 = tpu.matmul %0, %1, %cst {dimension_numbers = #tpu.dot_dimension_numbers<[1], [0], [0], [1], [0, 0, 1, 1], [], []>} : vector<64x128xbf16>, vector<128x640xbf16>, vector<64x640xf32> -> vector<64x640xf32>
    %3 = vector.extract_strided_slice %2 {offsets = [0, 0], sizes = [64, 512], strides = [1, 1]} : vector<64x640xf32> to vector<64x512xf32>
    %c0_3 = arith.constant 0 : index
    %c0_4 = arith.constant 0 : index
    %4 = vector.load %arg5[%c0_3, %c0_4] : memref<1x512xf32, #tpu.memory_space<vmem>>, vector<1x512xf32>
    %5 = vector.broadcast %4 : vector<1x512xf32> to vector<64x512xf32>
    %6 = arith.addf %3, %5 : vector<64x512xf32>
    %7 = vector.extract_strided_slice %2 {offsets = [0, 512], sizes = [64, 128], strides = [1, 1]} : vector<64x640xf32> to vector<64x128xf32>
    %8 = arith.negf %7 : vector<64x128xf32>
    %9 = math.exp %8 : vector<64x128xf32>
    %cst_5 = arith.constant 1.000000e+00 : f32
    %10 = vector.broadcast %cst_5 : f32 to vector<64x128xf32>
    %11 = arith.addf %10, %9 : vector<64x128xf32>
    %12 = arith.divf %10, %11 : vector<64x128xf32>
    %c0_6 = arith.constant 0 : index
    %c0_7 = arith.constant 0 : index
    %13 = vector.load %arg1[%c0_6, %c0_7] : memref<8x128xf32, #tpu.memory_space<vmem>>, vector<8x128xf32>
    %c0_8 = arith.constant 0 : index
    %c0_9 = arith.constant 0 : index
    %14 = vector.load %arg2[%c0_8, %c0_9] : memref<8x128xf32, #tpu.memory_space<vmem>>, vector<8x128xf32>
    %15 = vector.extract_strided_slice %6 {offsets = [0, 0], sizes = [8, 512], strides = [1, 1]} : vector<64x512xf32> to vector<8x512xf32>
    %16 = arith.truncf %13 : vector<8x128xf32> to vector<8x128xbf16>
    %c0_10 = arith.constant 0 : index
    %c0_11 = arith.constant 0 : index
    %17 = vector.load %arg4[%c0_10, %c0_11] : memref<128x512xbf16, #tpu.memory_space<vmem>>, vector<128x512xbf16>
    %cst_12 = arith.constant dense<0.000000e+00> : vector<8x512xf32>
    %18 = tpu.matmul %16, %17, %cst_12 {dimension_numbers = #tpu.dot_dimension_numbers<[1], [0], [0], [1], [0, 0, 1, 1], [], []>} : vector<8x128xbf16>, vector<128x512xbf16>, vector<8x512xf32> -> vector<8x512xf32>
    %19 = arith.addf %15, %18 : vector<8x512xf32>
    %20 = vector.extract_strided_slice %19 {offsets = [0, 0], sizes = [8, 128], strides = [1, 1]} : vector<8x512xf32> to vector<8x128xf32>
    %21 = arith.negf %20 : vector<8x128xf32>
    %22 = math.exp %21 : vector<8x128xf32>
    %cst_13 = arith.constant 1.000000e+00 : f32
    %23 = vector.broadcast %cst_13 : f32 to vector<8x128xf32>
    %24 = arith.addf %23, %22 : vector<8x128xf32>
    %25 = arith.divf %23, %24 : vector<8x128xf32>
    %26 = vector.extract_strided_slice %19 {offsets = [0, 128], sizes = [8, 128], strides = [1, 1]} : vector<8x512xf32> to vector<8x128xf32>
    %27 = arith.negf %26 : vector<8x128xf32>
    %28 = math.exp %27 : vector<8x128xf32>
    %cst_14 = arith.constant 1.000000e+00 : f32
    %29 = vector.broadcast %cst_14 : f32 to vector<8x128xf32>
    %30 = arith.addf %29, %28 : vector<8x128xf32>
    %31 = arith.divf %29, %30 : vector<8x128xf32>
    %32 = vector.extract_strided_slice %19 {offsets = [0, 256], sizes = [8, 128], strides = [1, 1]} : vector<8x512xf32> to vector<8x128xf32>
    %33 = math.tanh %32 : vector<8x128xf32>
    %34 = vector.extract_strided_slice %19 {offsets = [0, 384], sizes = [8, 128], strides = [1, 1]} : vector<8x512xf32> to vector<8x128xf32>
    %35 = arith.negf %34 : vector<8x128xf32>
    %36 = math.exp %35 : vector<8x128xf32>
    %cst_15 = arith.constant 1.000000e+00 : f32
    %37 = vector.broadcast %cst_15 : f32 to vector<8x128xf32>
    %38 = arith.addf %37, %36 : vector<8x128xf32>
    %39 = arith.divf %37, %38 : vector<8x128xf32>
    %40 = arith.mulf %31, %14 : vector<8x128xf32>
    %41 = arith.mulf %25, %33 : vector<8x128xf32>
    %42 = arith.addf %40, %41 : vector<8x128xf32>
    %43 = math.tanh %42 : vector<8x128xf32>
    %44 = arith.mulf %39, %43 : vector<8x128xf32>
    %45 = vector.extract_strided_slice %6 {offsets = [8, 0], sizes = [8, 512], strides = [1, 1]} : vector<64x512xf32> to vector<8x512xf32>
    %46 = arith.truncf %44 : vector<8x128xf32> to vector<8x128xbf16>
    %c0_16 = arith.constant 0 : index
    %c0_17 = arith.constant 0 : index
    %47 = vector.load %arg4[%c0_16, %c0_17] : memref<128x512xbf16, #tpu.memory_space<vmem>>, vector<128x512xbf16>
    %cst_18 = arith.constant dense<0.000000e+00> : vector<8x512xf32>
    %48 = tpu.matmul %46, %47, %cst_18 {dimension_numbers = #tpu.dot_dimension_numbers<[1], [0], [0], [1], [0, 0, 1, 1], [], []>} : vector<8x128xbf16>, vector<128x512xbf16>, vector<8x512xf32> -> vector<8x512xf32>
    %49 = arith.addf %45, %48 : vector<8x512xf32>
    %50 = vector.extract_strided_slice %49 {offsets = [0, 0], sizes = [8, 128], strides = [1, 1]} : vector<8x512xf32> to vector<8x128xf32>
    %51 = arith.negf %50 : vector<8x128xf32>
    %52 = math.exp %51 : vector<8x128xf32>
    %cst_19 = arith.constant 1.000000e+00 : f32
    %53 = vector.broadcast %cst_19 : f32 to vector<8x128xf32>
    %54 = arith.addf %53, %52 : vector<8x128xf32>
    %55 = arith.divf %53, %54 : vector<8x128xf32>
    %56 = vector.extract_strided_slice %49 {offsets = [0, 128], sizes = [8, 128], strides = [1, 1]} : vector<8x512xf32> to vector<8x128xf32>
    %57 = arith.negf %56 : vector<8x128xf32>
    %58 = math.exp %57 : vector<8x128xf32>
    %cst_20 = arith.constant 1.000000e+00 : f32
    %59 = vector.broadcast %cst_20 : f32 to vector<8x128xf32>
    %60 = arith.addf %59, %58 : vector<8x128xf32>
    %61 = arith.divf %59, %60 : vector<8x128xf32>
    %62 = vector.extract_strided_slice %49 {offsets = [0, 256], sizes = [8, 128], strides = [1, 1]} : vector<8x512xf32> to vector<8x128xf32>
    %63 = math.tanh %62 : vector<8x128xf32>
    %64 = vector.extract_strided_slice %49 {offsets = [0, 384], sizes = [8, 128], strides = [1, 1]} : vector<8x512xf32> to vector<8x128xf32>
    %65 = arith.negf %64 : vector<8x128xf32>
    %66 = math.exp %65 : vector<8x128xf32>
    %cst_21 = arith.constant 1.000000e+00 : f32
    %67 = vector.broadcast %cst_21 : f32 to vector<8x128xf32>
    %68 = arith.addf %67, %66 : vector<8x128xf32>
    %69 = arith.divf %67, %68 : vector<8x128xf32>
    %70 = arith.mulf %61, %42 : vector<8x128xf32>
    %71 = arith.mulf %55, %63 : vector<8x128xf32>
    %72 = arith.addf %70, %71 : vector<8x128xf32>
    %73 = math.tanh %72 : vector<8x128xf32>
    %74 = arith.mulf %69, %73 : vector<8x128xf32>
    %75 = vector.extract_strided_slice %6 {offsets = [16, 0], sizes = [8, 512], strides = [1, 1]} : vector<64x512xf32> to vector<8x512xf32>
    %76 = arith.truncf %74 : vector<8x128xf32> to vector<8x128xbf16>
    %c0_22 = arith.constant 0 : index
    %c0_23 = arith.constant 0 : index
    %77 = vector.load %arg4[%c0_22, %c0_23] : memref<128x512xbf16, #tpu.memory_space<vmem>>, vector<128x512xbf16>
    %cst_24 = arith.constant dense<0.000000e+00> : vector<8x512xf32>
    %78 = tpu.matmul %76, %77, %cst_24 {dimension_numbers = #tpu.dot_dimension_numbers<[1], [0], [0], [1], [0, 0, 1, 1], [], []>} : vector<8x128xbf16>, vector<128x512xbf16>, vector<8x512xf32> -> vector<8x512xf32>
    %79 = arith.addf %75, %78 : vector<8x512xf32>
    %80 = vector.extract_strided_slice %79 {offsets = [0, 0], sizes = [8, 128], strides = [1, 1]} : vector<8x512xf32> to vector<8x128xf32>
    %81 = arith.negf %80 : vector<8x128xf32>
    %82 = math.exp %81 : vector<8x128xf32>
    %cst_25 = arith.constant 1.000000e+00 : f32
    %83 = vector.broadcast %cst_25 : f32 to vector<8x128xf32>
    %84 = arith.addf %83, %82 : vector<8x128xf32>
    %85 = arith.divf %83, %84 : vector<8x128xf32>
    %86 = vector.extract_strided_slice %79 {offsets = [0, 128], sizes = [8, 128], strides = [1, 1]} : vector<8x512xf32> to vector<8x128xf32>
    %87 = arith.negf %86 : vector<8x128xf32>
    %88 = math.exp %87 : vector<8x128xf32>
    %cst_26 = arith.constant 1.000000e+00 : f32
    %89 = vector.broadcast %cst_26 : f32 to vector<8x128xf32>
    %90 = arith.addf %89, %88 : vector<8x128xf32>
    %91 = arith.divf %89, %90 : vector<8x128xf32>
    %92 = vector.extract_strided_slice %79 {offsets = [0, 256], sizes = [8, 128], strides = [1, 1]} : vector<8x512xf32> to vector<8x128xf32>
    %93 = math.tanh %92 : vector<8x128xf32>
    %94 = vector.extract_strided_slice %79 {offsets = [0, 384], sizes = [8, 128], strides = [1, 1]} : vector<8x512xf32> to vector<8x128xf32>
    %95 = arith.negf %94 : vector<8x128xf32>
    %96 = math.exp %95 : vector<8x128xf32>
    %cst_27 = arith.constant 1.000000e+00 : f32
    %97 = vector.broadcast %cst_27 : f32 to vector<8x128xf32>
    %98 = arith.addf %97, %96 : vector<8x128xf32>
    %99 = arith.divf %97, %98 : vector<8x128xf32>
    %100 = arith.mulf %91, %72 : vector<8x128xf32>
    %101 = arith.mulf %85, %93 : vector<8x128xf32>
    %102 = arith.addf %100, %101 : vector<8x128xf32>
    %103 = math.tanh %102 : vector<8x128xf32>
    %104 = arith.mulf %99, %103 : vector<8x128xf32>
    %105 = vector.extract_strided_slice %6 {offsets = [24, 0], sizes = [8, 512], strides = [1, 1]} : vector<64x512xf32> to vector<8x512xf32>
    %106 = arith.truncf %104 : vector<8x128xf32> to vector<8x128xbf16>
    %c0_28 = arith.constant 0 : index
    %c0_29 = arith.constant 0 : index
    %107 = vector.load %arg4[%c0_28, %c0_29] : memref<128x512xbf16, #tpu.memory_space<vmem>>, vector<128x512xbf16>
    %cst_30 = arith.constant dense<0.000000e+00> : vector<8x512xf32>
    %108 = tpu.matmul %106, %107, %cst_30 {dimension_numbers = #tpu.dot_dimension_numbers<[1], [0], [0], [1], [0, 0, 1, 1], [], []>} : vector<8x128xbf16>, vector<128x512xbf16>, vector<8x512xf32> -> vector<8x512xf32>
    %109 = arith.addf %105, %108 : vector<8x512xf32>
    %110 = vector.extract_strided_slice %109 {offsets = [0, 0], sizes = [8, 128], strides = [1, 1]} : vector<8x512xf32> to vector<8x128xf32>
    %111 = arith.negf %110 : vector<8x128xf32>
    %112 = math.exp %111 : vector<8x128xf32>
    %cst_31 = arith.constant 1.000000e+00 : f32
    %113 = vector.broadcast %cst_31 : f32 to vector<8x128xf32>
    %114 = arith.addf %113, %112 : vector<8x128xf32>
    %115 = arith.divf %113, %114 : vector<8x128xf32>
    %116 = vector.extract_strided_slice %109 {offsets = [0, 128], sizes = [8, 128], strides = [1, 1]} : vector<8x512xf32> to vector<8x128xf32>
    %117 = arith.negf %116 : vector<8x128xf32>
    %118 = math.exp %117 : vector<8x128xf32>
    %cst_32 = arith.constant 1.000000e+00 : f32
    %119 = vector.broadcast %cst_32 : f32 to vector<8x128xf32>
    %120 = arith.addf %119, %118 : vector<8x128xf32>
    %121 = arith.divf %119, %120 : vector<8x128xf32>
    %122 = vector.extract_strided_slice %109 {offsets = [0, 256], sizes = [8, 128], strides = [1, 1]} : vector<8x512xf32> to vector<8x128xf32>
    %123 = math.tanh %122 : vector<8x128xf32>
    %124 = vector.extract_strided_slice %109 {offsets = [0, 384], sizes = [8, 128], strides = [1, 1]} : vector<8x512xf32> to vector<8x128xf32>
    %125 = arith.negf %124 : vector<8x128xf32>
    %126 = math.exp %125 : vector<8x128xf32>
    %cst_33 = arith.constant 1.000000e+00 : f32
    %127 = vector.broadcast %cst_33 : f32 to vector<8x128xf32>
    %128 = arith.addf %127, %126 : vector<8x128xf32>
    %129 = arith.divf %127, %128 : vector<8x128xf32>
    %130 = arith.mulf %121, %102 : vector<8x128xf32>
    %131 = arith.mulf %115, %123 : vector<8x128xf32>
    %132 = arith.addf %130, %131 : vector<8x128xf32>
    %133 = math.tanh %132 : vector<8x128xf32>
    %134 = arith.mulf %129, %133 : vector<8x128xf32>
    %135 = vector.extract_strided_slice %6 {offsets = [32, 0], sizes = [8, 512], strides = [1, 1]} : vector<64x512xf32> to vector<8x512xf32>
    %136 = arith.truncf %134 : vector<8x128xf32> to vector<8x128xbf16>
    %c0_34 = arith.constant 0 : index
    %c0_35 = arith.constant 0 : index
    %137 = vector.load %arg4[%c0_34, %c0_35] : memref<128x512xbf16, #tpu.memory_space<vmem>>, vector<128x512xbf16>
    %cst_36 = arith.constant dense<0.000000e+00> : vector<8x512xf32>
    %138 = tpu.matmul %136, %137, %cst_36 {dimension_numbers = #tpu.dot_dimension_numbers<[1], [0], [0], [1], [0, 0, 1, 1], [], []>} : vector<8x128xbf16>, vector<128x512xbf16>, vector<8x512xf32> -> vector<8x512xf32>
    %139 = arith.addf %135, %138 : vector<8x512xf32>
    %140 = vector.extract_strided_slice %139 {offsets = [0, 0], sizes = [8, 128], strides = [1, 1]} : vector<8x512xf32> to vector<8x128xf32>
    %141 = arith.negf %140 : vector<8x128xf32>
    %142 = math.exp %141 : vector<8x128xf32>
    %cst_37 = arith.constant 1.000000e+00 : f32
    %143 = vector.broadcast %cst_37 : f32 to vector<8x128xf32>
    %144 = arith.addf %143, %142 : vector<8x128xf32>
    %145 = arith.divf %143, %144 : vector<8x128xf32>
    %146 = vector.extract_strided_slice %139 {offsets = [0, 128], sizes = [8, 128], strides = [1, 1]} : vector<8x512xf32> to vector<8x128xf32>
    %147 = arith.negf %146 : vector<8x128xf32>
    %148 = math.exp %147 : vector<8x128xf32>
    %cst_38 = arith.constant 1.000000e+00 : f32
    %149 = vector.broadcast %cst_38 : f32 to vector<8x128xf32>
    %150 = arith.addf %149, %148 : vector<8x128xf32>
    %151 = arith.divf %149, %150 : vector<8x128xf32>
    %152 = vector.extract_strided_slice %139 {offsets = [0, 256], sizes = [8, 128], strides = [1, 1]} : vector<8x512xf32> to vector<8x128xf32>
    %153 = math.tanh %152 : vector<8x128xf32>
    %154 = vector.extract_strided_slice %139 {offsets = [0, 384], sizes = [8, 128], strides = [1, 1]} : vector<8x512xf32> to vector<8x128xf32>
    %155 = arith.negf %154 : vector<8x128xf32>
    %156 = math.exp %155 : vector<8x128xf32>
    %cst_39 = arith.constant 1.000000e+00 : f32
    %157 = vector.broadcast %cst_39 : f32 to vector<8x128xf32>
    %158 = arith.addf %157, %156 : vector<8x128xf32>
    %159 = arith.divf %157, %158 : vector<8x128xf32>
    %160 = arith.mulf %151, %132 : vector<8x128xf32>
    %161 = arith.mulf %145, %153 : vector<8x128xf32>
    %162 = arith.addf %160, %161 : vector<8x128xf32>
    %163 = math.tanh %162 : vector<8x128xf32>
    %164 = arith.mulf %159, %163 : vector<8x128xf32>
    %165 = vector.extract_strided_slice %6 {offsets = [40, 0], sizes = [8, 512], strides = [1, 1]} : vector<64x512xf32> to vector<8x512xf32>
    %166 = arith.truncf %164 : vector<8x128xf32> to vector<8x128xbf16>
    %c0_40 = arith.constant 0 : index
    %c0_41 = arith.constant 0 : index
    %167 = vector.load %arg4[%c0_40, %c0_41] : memref<128x512xbf16, #tpu.memory_space<vmem>>, vector<128x512xbf16>
    %cst_42 = arith.constant dense<0.000000e+00> : vector<8x512xf32>
    %168 = tpu.matmul %166, %167, %cst_42 {dimension_numbers = #tpu.dot_dimension_numbers<[1], [0], [0], [1], [0, 0, 1, 1], [], []>} : vector<8x128xbf16>, vector<128x512xbf16>, vector<8x512xf32> -> vector<8x512xf32>
    %169 = arith.addf %165, %168 : vector<8x512xf32>
    %170 = vector.extract_strided_slice %169 {offsets = [0, 0], sizes = [8, 128], strides = [1, 1]} : vector<8x512xf32> to vector<8x128xf32>
    %171 = arith.negf %170 : vector<8x128xf32>
    %172 = math.exp %171 : vector<8x128xf32>
    %cst_43 = arith.constant 1.000000e+00 : f32
    %173 = vector.broadcast %cst_43 : f32 to vector<8x128xf32>
    %174 = arith.addf %173, %172 : vector<8x128xf32>
    %175 = arith.divf %173, %174 : vector<8x128xf32>
    %176 = vector.extract_strided_slice %169 {offsets = [0, 128], sizes = [8, 128], strides = [1, 1]} : vector<8x512xf32> to vector<8x128xf32>
    %177 = arith.negf %176 : vector<8x128xf32>
    %178 = math.exp %177 : vector<8x128xf32>
    %cst_44 = arith.constant 1.000000e+00 : f32
    %179 = vector.broadcast %cst_44 : f32 to vector<8x128xf32>
    %180 = arith.addf %179, %178 : vector<8x128xf32>
    %181 = arith.divf %179, %180 : vector<8x128xf32>
    %182 = vector.extract_strided_slice %169 {offsets = [0, 256], sizes = [8, 128], strides = [1, 1]} : vector<8x512xf32> to vector<8x128xf32>
    %183 = math.tanh %182 : vector<8x128xf32>
    %184 = vector.extract_strided_slice %169 {offsets = [0, 384], sizes = [8, 128], strides = [1, 1]} : vector<8x512xf32> to vector<8x128xf32>
    %185 = arith.negf %184 : vector<8x128xf32>
    %186 = math.exp %185 : vector<8x128xf32>
    %cst_45 = arith.constant 1.000000e+00 : f32
    %187 = vector.broadcast %cst_45 : f32 to vector<8x128xf32>
    %188 = arith.addf %187, %186 : vector<8x128xf32>
    %189 = arith.divf %187, %188 : vector<8x128xf32>
    %190 = arith.mulf %181, %162 : vector<8x128xf32>
    %191 = arith.mulf %175, %183 : vector<8x128xf32>
    %192 = arith.addf %190, %191 : vector<8x128xf32>
    %193 = math.tanh %192 : vector<8x128xf32>
    %194 = arith.mulf %189, %193 : vector<8x128xf32>
    %195 = vector.extract_strided_slice %6 {offsets = [48, 0], sizes = [8, 512], strides = [1, 1]} : vector<64x512xf32> to vector<8x512xf32>
    %196 = arith.truncf %194 : vector<8x128xf32> to vector<8x128xbf16>
    %c0_46 = arith.constant 0 : index
    %c0_47 = arith.constant 0 : index
    %197 = vector.load %arg4[%c0_46, %c0_47] : memref<128x512xbf16, #tpu.memory_space<vmem>>, vector<128x512xbf16>
    %cst_48 = arith.constant dense<0.000000e+00> : vector<8x512xf32>
    %198 = tpu.matmul %196, %197, %cst_48 {dimension_numbers = #tpu.dot_dimension_numbers<[1], [0], [0], [1], [0, 0, 1, 1], [], []>} : vector<8x128xbf16>, vector<128x512xbf16>, vector<8x512xf32> -> vector<8x512xf32>
    %199 = arith.addf %195, %198 : vector<8x512xf32>
    %200 = vector.extract_strided_slice %199 {offsets = [0, 0], sizes = [8, 128], strides = [1, 1]} : vector<8x512xf32> to vector<8x128xf32>
    %201 = arith.negf %200 : vector<8x128xf32>
    %202 = math.exp %201 : vector<8x128xf32>
    %cst_49 = arith.constant 1.000000e+00 : f32
    %203 = vector.broadcast %cst_49 : f32 to vector<8x128xf32>
    %204 = arith.addf %203, %202 : vector<8x128xf32>
    %205 = arith.divf %203, %204 : vector<8x128xf32>
    %206 = vector.extract_strided_slice %199 {offsets = [0, 128], sizes = [8, 128], strides = [1, 1]} : vector<8x512xf32> to vector<8x128xf32>
    %207 = arith.negf %206 : vector<8x128xf32>
    %208 = math.exp %207 : vector<8x128xf32>
    %cst_50 = arith.constant 1.000000e+00 : f32
    %209 = vector.broadcast %cst_50 : f32 to vector<8x128xf32>
    %210 = arith.addf %209, %208 : vector<8x128xf32>
    %211 = arith.divf %209, %210 : vector<8x128xf32>
    %212 = vector.extract_strided_slice %199 {offsets = [0, 256], sizes = [8, 128], strides = [1, 1]} : vector<8x512xf32> to vector<8x128xf32>
    %213 = math.tanh %212 : vector<8x128xf32>
    %214 = vector.extract_strided_slice %199 {offsets = [0, 384], sizes = [8, 128], strides = [1, 1]} : vector<8x512xf32> to vector<8x128xf32>
    %215 = arith.negf %214 : vector<8x128xf32>
    %216 = math.exp %215 : vector<8x128xf32>
    %cst_51 = arith.constant 1.000000e+00 : f32
    %217 = vector.broadcast %cst_51 : f32 to vector<8x128xf32>
    %218 = arith.addf %217, %216 : vector<8x128xf32>
    %219 = arith.divf %217, %218 : vector<8x128xf32>
    %220 = arith.mulf %211, %192 : vector<8x128xf32>
    %221 = arith.mulf %205, %213 : vector<8x128xf32>
    %222 = arith.addf %220, %221 : vector<8x128xf32>
    %223 = math.tanh %222 : vector<8x128xf32>
    %224 = arith.mulf %219, %223 : vector<8x128xf32>
    %225 = vector.extract_strided_slice %6 {offsets = [56, 0], sizes = [8, 512], strides = [1, 1]} : vector<64x512xf32> to vector<8x512xf32>
    %226 = arith.truncf %224 : vector<8x128xf32> to vector<8x128xbf16>
    %c0_52 = arith.constant 0 : index
    %c0_53 = arith.constant 0 : index
    %227 = vector.load %arg4[%c0_52, %c0_53] : memref<128x512xbf16, #tpu.memory_space<vmem>>, vector<128x512xbf16>
    %cst_54 = arith.constant dense<0.000000e+00> : vector<8x512xf32>
    %228 = tpu.matmul %226, %227, %cst_54 {dimension_numbers = #tpu.dot_dimension_numbers<[1], [0], [0], [1], [0, 0, 1, 1], [], []>} : vector<8x128xbf16>, vector<128x512xbf16>, vector<8x512xf32> -> vector<8x512xf32>
    %229 = arith.addf %225, %228 : vector<8x512xf32>
    %230 = vector.extract_strided_slice %229 {offsets = [0, 0], sizes = [8, 128], strides = [1, 1]} : vector<8x512xf32> to vector<8x128xf32>
    %231 = arith.negf %230 : vector<8x128xf32>
    %232 = math.exp %231 : vector<8x128xf32>
    %cst_55 = arith.constant 1.000000e+00 : f32
    %233 = vector.broadcast %cst_55 : f32 to vector<8x128xf32>
    %234 = arith.addf %233, %232 : vector<8x128xf32>
    %235 = arith.divf %233, %234 : vector<8x128xf32>
    %236 = vector.extract_strided_slice %229 {offsets = [0, 128], sizes = [8, 128], strides = [1, 1]} : vector<8x512xf32> to vector<8x128xf32>
    %237 = arith.negf %236 : vector<8x128xf32>
    %238 = math.exp %237 : vector<8x128xf32>
    %cst_56 = arith.constant 1.000000e+00 : f32
    %239 = vector.broadcast %cst_56 : f32 to vector<8x128xf32>
    %240 = arith.addf %239, %238 : vector<8x128xf32>
    %241 = arith.divf %239, %240 : vector<8x128xf32>
    %242 = vector.extract_strided_slice %229 {offsets = [0, 256], sizes = [8, 128], strides = [1, 1]} : vector<8x512xf32> to vector<8x128xf32>
    %243 = math.tanh %242 : vector<8x128xf32>
    %244 = vector.extract_strided_slice %229 {offsets = [0, 384], sizes = [8, 128], strides = [1, 1]} : vector<8x512xf32> to vector<8x128xf32>
    %245 = arith.negf %244 : vector<8x128xf32>
    %246 = math.exp %245 : vector<8x128xf32>
    %cst_57 = arith.constant 1.000000e+00 : f32
    %247 = vector.broadcast %cst_57 : f32 to vector<8x128xf32>
    %248 = arith.addf %247, %246 : vector<8x128xf32>
    %249 = arith.divf %247, %248 : vector<8x128xf32>
    %250 = arith.mulf %241, %222 : vector<8x128xf32>
    %251 = arith.mulf %235, %243 : vector<8x128xf32>
    %252 = arith.addf %250, %251 : vector<8x128xf32>
    %253 = math.tanh %252 : vector<8x128xf32>
    %254 = arith.mulf %249, %253 : vector<8x128xf32>
    %255 = tpu.concatenate %44, %74, %104, %134, %164, %194, %224, %254 in 0 : vector<8x128xf32>, vector<8x128xf32>, vector<8x128xf32>, vector<8x128xf32>, vector<8x128xf32>, vector<8x128xf32>, vector<8x128xf32>, vector<8x128xf32> -> vector<64x128xf32>
    %c0_58 = arith.constant 0 : index
    %c0_59 = arith.constant 0 : index
    %256 = vector.load %arg7[%c0_58, %c0_59] : memref<64x128xf32, #tpu.memory_space<vmem>>, vector<64x128xf32>
    tpu.vector_store %arg7[%c0_58, %c0_59], %255 {strides = array<i32>} : memref<64x128xf32, #tpu.memory_space<vmem>>, vector<64x128xf32>,
    %c0_60 = arith.constant 0 : index
    %c0_61 = arith.constant 0 : index
    %257 = vector.load %arg8[%c0_60, %c0_61] : memref<8x128xf32, #tpu.memory_space<vmem>>, vector<8x128xf32>
    tpu.vector_store %arg8[%c0_60, %c0_61], %254 {strides = array<i32>} : memref<8x128xf32, #tpu.memory_space<vmem>>, vector<8x128xf32>,
    %c0_62 = arith.constant 0 : index
    %c0_63 = arith.constant 0 : index
    %258 = vector.load %arg9[%c0_62, %c0_63] : memref<8x128xf32, #tpu.memory_space<vmem>>, vector<8x128xf32>
    tpu.vector_store %arg9[%c0_62, %c0_63], %252 {strides = array<i32>} : memref<8x128xf32, #tpu.memory_space<vmem>>, vector<8x128xf32>,
    %259 = math.tanh %252 : vector<8x128xf32>
    %260 = tpu.concatenate %259, %259, %259, %259, %259, %259, %259, %259 in 0 : vector<8x128xf32>, vector<8x128xf32>, vector<8x128xf32>, vector<8x128xf32>, vector<8x128xf32>, vector<8x128xf32>, vector<8x128xf32>, vector<8x128xf32> -> vector<64x128xf32>
    %261 = arith.mulf %12, %260 : vector<64x128xf32>
    %c0_64 = arith.constant 0 : index
    %c0_65 = arith.constant 0 : index
    %262 = vector.load %arg6[%c0_64, %c0_65] : memref<64x128xf32, #tpu.memory_space<vmem>>, vector<64x128xf32>
    tpu.vector_store %arg6[%c0_64, %c0_65], %261 {strides = array<i32>} : memref<64x128xf32, #tpu.memory_space<vmem>>, vector<64x128xf32>,
    return
  }
}

</mosaic_0001>

<bundles_post_ra>
// kernel: tpu_custom_call.1
= control target key start
LH: loop header
LB: loop body
LE: loop exit
PB: predicated region body
PF: predicated region fallthrough
CT: control target
= control target key end

     0   :  { %15 = vsyncpa [#allocation3], 0  ;;  %s3177_s0 = inlined_call_operand.hbm [shape: bf16[64,128], index: 0, kind: input, shape index: {}]   ;;  %s3178_s1 = inlined_call_operand.hbm [shape: f32[8,128], index: 1, kind: input, shape index: {}]   ;;  %s3179_s2 = inlined_call_operand.hbm [shape: f32[8,128], index: 2, kind: input, shape index: {}]   ;;  %s3180_s3 = inlined_call_operand.hbm [shape: bf16[128,640], index: 3, kind: input, shape index: {}]   ;;  %s3181_s4 = inlined_call_operand.hbm [shape: bf16[128,512], index: 4, kind: input, shape index: {}]   ;;  %s3182_s5 = inlined_call_operand.vmem [shape: f32[1,512], index: 5, kind: input, shape index: {}]   ;;  %s3183_s6 = inlined_call_operand.hbm [shape: f32[64,128], index: 6, kind: output, shape index: {0}]   ;;  %s3184_s7 = inlined_call_operand.hbm [shape: f32[64,128], index: 7, kind: output, shape index: {1}]   ;;  %s3185_s8 = inlined_call_operand.hbm [shape: f32[8,128], index: 8, kind: output, shape index: {2}]   ;;  %s3186_s9 = inlined_call_operand.hbm [shape: f32[8,128], index: 9, kind: output, shape index: {3}]  }
   0x1   :  { %16 = vsyncpa [#allocation6], 0 }
   0x2   :  { %17 = vsyncpa [#allocation9], 0 }
   0x3   :  { %18 = vsyncpa [#allocation4], 0 }
   0x4   :  { %19 = vsyncpa [#allocation13], 0 }
   0x5   :  { %20 = vsyncpa [#allocation16], 0  ;;  %s2520_s30 = smov [#allocation5]   ;;  %s2521_s11 = smov [#allocation8]  }
   0x6   :  { %s39_s10 = sshll.u32 %s2520_s30, 4  ;;  %s58_s12 = sshll.u32 %s2521_s11, 4  ;;  %s40_s10 = int_to_ptr.vmem [resolvable:$true] %s39_s10  ;;  %s59_s12 = int_to_ptr.vmem [resolvable:$true] %s58_s12 }
   0x7   :  { %s2336_s13 = scalar_lea.vmem %s40_s10, 128  ;;  %p2341_p1 = scmp.lt.s32.totalorder %s40_s10, %s40_s10 }
   0x8   :  { %p2337_p0 = scmp.ne.s32.totalorder %s40_s10, %s2336_s13  ;;  %p2342_p2 = scmp.lt.s32.totalorder %s2336_s13, %s2336_s13 }
   0xa   :  { %p2343_p3 = por %p2342_p2, %p2341_p1 }
   0xc   :  { %p2344_p4 = pnand %p2343_p3, %p2337_p0 }
   0xe   :  { %2347 = shalt.err (!%p2344_p4)
}
   0xf   :  { %42 = dma.hbm_to_vmem [thread:$0]  %s3178_s1, 128, %s40_s10, [#allocation6]  }
  0x10   :  { %s2356_s16 = scalar_lea.vmem %s59_s12, 5120  ;;  %p2361_p6 = scmp.lt.s32.totalorder %s59_s12, %s59_s12 }
  0x11   :  { %p2357_p5 = scmp.ne.s32.totalorder %s59_s12, %s2356_s16  ;;  %p2362_p7 = scmp.lt.s32.totalorder %s2356_s16, %s2356_s16 }
  0x13   :  { %p2363_p8 = por %p2362_p7, %p2361_p6 }
  0x15   :  { %p2364_p9 = pnand %p2363_p8, %p2357_p5 }
  0x17   :  { %2367 = shalt.err (!%p2364_p9)
}
  0x18   :  { %s2522_s17 = smov 320   ;;  %s2523_s18 = smov 20  }
  0x19   :  { %64 = dma.hbm_to_vmem [thread:$0]  %s3180_s3, 5120, %s59_s12, [#allocation9], %s2522_s17, %s2522_s17, %s2523_s18  }
  0x1a   :  { %s2524_s21 = smov [#allocation2]  }
  0x1b   :  { %s26_s22 = sshll.u32 %s2524_s21, 4  ;;  %s27_s22 = int_to_ptr.vmem [resolvable:$true] %s26_s22 }
  0x1c   :  { %s2376_s23 = scalar_lea.vmem %s27_s22, 512  ;;  %p2381_p11 = scmp.lt.s32.totalorder %s27_s22, %s27_s22 }
  0x1d   :  { %p2377_p10 = scmp.ne.s32.totalorder %s27_s22, %s2376_s23  ;;  %p2382_p12 = scmp.lt.s32.totalorder %s2376_s23, %s2376_s23 }
  0x1f   :  { %p2383_p13 = por %p2382_p12, %p2381_p11 }
  0x21   :  { %p2384_p0 = pnand %p2383_p13, %p2377_p10 }
  0x23   :  { %2387 = shalt.err (!%p2384_p0)
}
  0x24   :  { %s2525_s1 = smov 64   ;;  %s2526_s24 = smov 4  }
  0x25   :  { %32 = dma.hbm_to_vmem [thread:$0]  %s3177_s0, 512, %s27_s22, [#allocation3], %s2525_s1, %s2525_s1, %s2526_s24  }
  0x26   :  { %s2527_s27 = smov [#allocation7]   ;;  %s2528_s3 = smov [#allocation10]  }
  0x27   :  { %s49_s28 = sshll.u32 %s2527_s27, 4  ;;  %s70_s29 = sshll.u32 %s2528_s3, 4  ;;  %s50_s28 = int_to_ptr.vmem [resolvable:$true] %s49_s28  ;;  %s71_s29 = int_to_ptr.vmem [resolvable:$true] %s70_s29 }
  0x28   :  { %s2396_s30 = scalar_lea.vmem %s50_s28, 128  ;;  %p2401_p2 = scmp.lt.s32.totalorder %s50_s28, %s50_s28 }
  0x29   :  { %p2397_p1 = scmp.ne.s32.totalorder %s50_s28, %s2396_s30  ;;  %p2402_p3 = scmp.lt.s32.totalorder %s2396_s30, %s2396_s30 }
  0x2b   :  { %p2403_p4 = por %p2402_p3, %p2401_p2 }
  0x2d   :  { %p2404_p5 = pnand %p2403_p4, %p2397_p1 }
  0x2f   :  { %2407 = shalt.err (!%p2404_p5)
}
  0x30   :  { %52 = dma.hbm_to_vmem [thread:$0]  %s3179_s2, 128, %s50_s28, [#allocation6]  }
  0x31   :  { %s2416_s12 = scalar_lea.vmem %s71_s29, 4096  ;;  %p2421_p7 = scmp.lt.s32.totalorder %s71_s29, %s71_s29 }
  0x32   :  { %p2417_p6 = scmp.ne.s32.totalorder %s71_s29, %s2416_s12  ;;  %p2422_p8 = scmp.lt.s32.totalorder %s2416_s12, %s2416_s12 }
  0x34   :  { %p2423_p9 = por %p2422_p8, %p2421_p7 }
  0x36   :  { %p2424_p10 = pnand %p2423_p9, %p2417_p6 }
  0x38   :  { %2427 = shalt.err (!%p2424_p10)
}
  0x39   :  { %s2529_s0 = smov 256   ;;  %s2530_s13 = smov 16  }
  0x3a   :  { %76 = dma.hbm_to_vmem [thread:$0]  %s3181_s4, 4096, %s71_s29, [#allocation9], %s2529_s0, %s2529_s0, %s2530_s13  }
  0x3b   :  { %2508 = dma.done.wait [#allocation3], 512  }
  0x3c   :  { %2509 = vsyncadd [#allocation3], 4294966784 }
  0x3d   :  { %2510 = dma.done.wait [#allocation6], 256  }
  0x3e   :  { %2511 = vsyncadd [#allocation6], 4294967040 }
  0x3f   :  { %2512 = dma.done.wait [#allocation9], 9216  }
  0x40   :  { %2513 = vsyncadd [#allocation9], 4294958080  ;;  %v3187_v0 = vmov 0   ;;  %v2028_v1 = vld [vmem:[#allocation8 + $0x11c] ss:$20 sps:$4 sm:$0xff]   ;;  %v2094_v49 = vld [vmem:[#allocation2 + $0x10] sm:$0xff]  }
  0x41   :  { %415 = vmatprep.mubr.bf16.mxu0 %v3187_v0  ;;  %488 = vmatprep.mubr.bf16.mxu1 %v3187_v0  ;;  %v2030_v2 = vld [vmem:[#allocation8 + $0x124] ss:$20 sps:$4 sm:$0xff]   ;;  %v2033_v4 = vld [vmem:[#allocation8 + $0x120] ss:$20 sps:$4 sm:$0xff]   ;;  %v2036_v6 = vld [vmem:[#allocation8 + $0xfc] ss:$20 sps:$4 sm:$0xff]  }
  0x42   :  { %383 = vmatprep.subr.bf16.mxu0 %v2028_v1  ;;  %v2032_v3 = vld [vmem:[#allocation8 + $0x118] ss:$20 sps:$4 sm:$0xff]   ;;  %456 = vmatprep.subr.bf16.mxu1 %v2030_v2  ;;  %v2034_v5 = vld [vmem:[#allocation8 + $0xf4] ss:$20 sps:$4 sm:$0xff]   ;;  %v2038_v7 = vld [vmem:[#allocation8 + $0xf0] ss:$20 sps:$4 sm:$0xff]  }
  0x43   :  { %384 = vmatpush1.bf16.msra.mxu0 %v2032_v3  ;;  %457 = vmatpush1.bf16.msra.mxu1 %v2033_v4  ;;  %v2039_v8 = vld [vmem:[#allocation8 + $0xf8] ss:$20 sps:$4 sm:$0xff]   ;;  %v2042_v10 = vld [vmem:[#allocation8 + $0xd4] ss:$20 sps:$4 sm:$0xff]   ;;  %v2045_v12 = vld [vmem:[#allocation8 + $0xd0] ss:$20 sps:$4 sm:$0xff]  }
  0x44   :  { %385 = vmatprep.subr.bf16.mxu0 %v2034_v5  ;;  %458 = vmatprep.subr.bf16.mxu1 %v2036_v6  ;;  %v2040_v9 = vld [vmem:[#allocation8 + $0xcc] ss:$20 sps:$4 sm:$0xff]   ;;  %v2044_v11 = vld [vmem:[#allocation8 + $0xc8] ss:$20 sps:$4 sm:$0xff]   ;;  %v2046_v13 = vld [vmem:[#allocation8 + $0xa4] ss:$20 sps:$4 sm:$0xff]  }
  0x45   :  { %v2048_v14 = vld [vmem:[#allocation8 + $0xac] ss:$20 sps:$4 sm:$0xff]   ;;  %v2051_v16 = vld [vmem:[#allocation8 + $0xa8] ss:$20 sps:$4 sm:$0xff]   ;;  %v2054_v18 = vld [vmem:[#allocation8 + $0x84] ss:$20 sps:$4 sm:$0xff]  }
  0x46   :  { %v2050_v15 = vld [vmem:[#allocation8 + $0xa0] ss:$20 sps:$4 sm:$0xff]   ;;  %v2052_v17 = vld [vmem:[#allocation8 + $0x7c] ss:$20 sps:$4 sm:$0xff]   ;;  %v2056_v19 = vld [vmem:[#allocation8 + $0x78] ss:$20 sps:$4 sm:$0xff]  }
  0x47   :  { %386 = vmatpush1.bf16.msra.mxu0 %v2038_v7  ;;  %459 = vmatpush1.bf16.msra.mxu1 %v2039_v8  ;;  %v2057_v20 = vld [vmem:[#allocation8 + $0x80] ss:$20 sps:$4 sm:$0xff]   ;;  %v2060_v22 = vld [vmem:[#allocation8 + $0x5c] ss:$20 sps:$4 sm:$0xff]   ;;  %v2063_v24 = vld [vmem:[#allocation8 + $0x58] ss:$20 sps:$4 sm:$0xff]  }
  0x48   :  { %387 = vmatprep.subr.bf16.mxu0 %v2040_v9  ;;  %460 = vmatprep.subr.bf16.mxu1 %v2042_v10  ;;  %v2058_v21 = vld [vmem:[#allocation8 + $0x54] ss:$20 sps:$4 sm:$0xff]   ;;  %v2062_v23 = vld [vmem:[#allocation8 + $0x50] ss:$20 sps:$4 sm:$0xff]   ;;  %v2064_v25 = vld [vmem:[#allocation8 + $0x2c] ss:$20 sps:$4 sm:$0xff]  }
  0x49   :  { %v2066_v26 = vld [vmem:[#allocation8 + $0x34] ss:$20 sps:$4 sm:$0xff]   ;;  %v2069_v28 = vld [vmem:[#allocation8 + $0x30] ss:$20 sps:$4 sm:$0xff]   ;;  %v2072_v30 = vld [vmem:[#allocation8 + $0xc] ss:$20 sps:$4 sm:$0xff]  }
  0x4a   :  { %v2068_v27 = vld [vmem:[#allocation8 + $0x28] ss:$20 sps:$4 sm:$0xff]   ;;  %v2070_v29 = vld [vmem:[#allocation8 + $0x4] ss:$20 sps:$4 sm:$0xff]   ;;  %v2074_v31 = vld [vmem:[#allocation8] ss:$20 sps:$4 sm:$0xff]  }
  0x4b   :  { %388 = vmatpush1.bf16.msra.mxu0 %v2044_v11  ;;  %461 = vmatpush1.bf16.msra.mxu1 %v2045_v12  ;;  %v2075_v32 = vld [vmem:[#allocation8 + $0x8] ss:$20 sps:$4 sm:$0xff]   ;;  %v2605_v34 = vld [vmem:[#allocation10 + $0xe4] ss:$16 sps:$4 sm:$0xff]   ;;  %v2609_v36 = vld [vmem:[#allocation10 + $0xe0] ss:$16 sps:$4 sm:$0xff]  }
  0x4c   :  { %389 = vmatprep.subr.bf16.mxu0 %v2046_v13  ;;  %462 = vmatprep.subr.bf16.mxu1 %v2048_v14  ;;  %v2077_v33 = vld [vmem:[#allocation8 + $0x128] ss:$20 sps:$4 sm:$0xff]   ;;  %v2607_v35 = vld [vmem:[#allocation2] sm:$0xff]   ;;  %v2086_v40 = vld [vmem:[#allocation8 + $0xd8] ss:$20 sps:$4 sm:$0xff]  }
  0x4d   :  { %v2081_v37 = vld [vmem:[#allocation8 + $0x100] ss:$20 sps:$4 sm:$0xff]   ;;  %v2624_v42 = vld [vmem:[#allocation2 + $0x8] sm:$0xff]   ;;  %v2090_v44 = vld [vmem:[#allocation8 + $0xb0] ss:$20 sps:$4 sm:$0xff]  }
  0x4e   :  { %v2612_v38 = vld [vmem:[#allocation10 + $0xc4] ss:$16 sps:$4 sm:$0xff]   ;;  %v2616_v39 = vld [vmem:[#allocation10 + $0xc0] ss:$16 sps:$4 sm:$0xff]   ;;  %v2095_v47 = vld [vmem:[#allocation8 + $0x88] ss:$20 sps:$4 sm:$0xff]  }
  0x4f   :  { %390 = vmatpush1.bf16.msra.mxu0 %v2050_v15  ;;  %463 = vmatpush1.bf16.msra.mxu1 %v2051_v16  ;;  %v2620_v41 = vld [vmem:[#allocation10 + $0xa4] ss:$16 sps:$4 sm:$0xff]   ;;  %v2627_v43 = vld [vmem:[#allocation10 + $0xa0] ss:$16 sps:$4 sm:$0xff]   ;;  %v2104_v54 = vld [vmem:[#allocation8 + $0x38] ss:$20 sps:$4 sm:$0xff]   ;;  %v596_v16 = vlaneseq }
  0x50   :  { %391 = vmatprep.subr.bf16.mxu0 %v2052_v17  ;;  %464 = vmatprep.subr.bf16.mxu1 %v2054_v18  ;;  %v2630_v45 = vld [vmem:[#allocation10 + $0x84] ss:$16 sps:$4 sm:$0xff]   ;;  %v2635_v46 = vld [vmem:[#allocation10 + $0x80] ss:$16 sps:$4 sm:$0xff]   ;;  %v2103_v56 = vld [vmem:[#allocation2 + $0x18] sm:$0xff]  }
  0x51   :  { %v2638_v48 = vld [vmem:[#allocation10 + $0x64] ss:$16 sps:$4 sm:$0xff]   ;;  %v2643_v50 = vld [vmem:[#allocation10 + $0x60] ss:$16 sps:$4 sm:$0xff]   ;;  %v2666_v62 = vld [vmem:[#allocation10 + $0xec] ss:$16 sps:$4 sm:$0xff]  }
  0x52   :  { %v2099_v51 = vld [vmem:[#allocation8 + $0x60] ss:$20 sps:$4 sm:$0xff]   ;;  %v2108_v58 = vld [vmem:[#allocation8 + $0x10] ss:$20 sps:$4 sm:$0xff]   ;;  %v2671_v1 = vld [vmem:[#allocation10 + $0xe8] ss:$16 sps:$4 sm:$0xff]  }
  0x53   :  { %392 = vmatpush1.bf16.msra.mxu0 %v2056_v19  ;;  %465 = vmatpush1.bf16.msra.mxu1 %v2057_v20  ;;  %v2646_v52 = vld [vmem:[#allocation10 + $0x44] ss:$16 sps:$4 sm:$0xff]   ;;  %v2649_v53 = vld [vmem:[#allocation10 + $0x40] ss:$16 sps:$4 sm:$0xff]   ;;  %v2674_v2 = vld [vmem:[#allocation10 + $0xcc] ss:$16 sps:$4 sm:$0xff]  }
  0x54   :  { %393 = vmatprep.subr.bf16.mxu0 %v2058_v21  ;;  %466 = vmatprep.subr.bf16.mxu1 %v2060_v22  ;;  %v2652_v55 = vld [vmem:[#allocation10 + $0x24] ss:$16 sps:$4 sm:$0xff]   ;;  %v2657_v57 = vld [vmem:[#allocation10 + $0x20] ss:$16 sps:$4 sm:$0xff]   ;;  %v2679_v3 = vld [vmem:[#allocation10 + $0xc8] ss:$16 sps:$4 sm:$0xff]  }
  0x55   :  { %v2660_v59 = vld [vmem:[#allocation10 + $0x4] ss:$16 sps:$4 sm:$0xff]   ;;  %v2663_v60 = vld [vmem:[#allocation10] ss:$16 sps:$4 sm:$0xff]   ;;  %v2682_v4 = vld [vmem:[#allocation10 + $0xac] ss:$16 sps:$4 sm:$0xff]  }
  0x56   :  { %v696_v61 = vld [vmem:[#allocation5] sm:$0xff]  ;;  %v2688_v5 = vld [vmem:[#allocation10 + $0xa8] ss:$16 sps:$4 sm:$0xff]   ;;  %v2691_v6 = vld [vmem:[#allocation10 + $0x8c] ss:$16 sps:$4 sm:$0xff]   ;;  %v597_v17 = vshrl.u32 %v596_v16, 7 }
  0x57   :  { %394 = vmatpush1.bf16.msra.mxu0 %v2062_v23  ;;  %467 = vmatpush1.bf16.msra.mxu1 %v2063_v24  ;;  %v698_v63 = vpack.c.bf16 %v696_v61, %v696_v61  ;;  %v2696_v7 = vld [vmem:[#allocation10 + $0x88] ss:$16 sps:$4 sm:$0xff]   ;;  %v2700_v8 = vld [vmem:[#allocation10 + $0x6c] ss:$16 sps:$4 sm:$0xff]   ;;  %v594_v22 = vld [vmem:[%s3182_s5] sm:$0xf] }
  0x58   :  { %395 = vmatprep.subr.bf16.mxu0 %v2064_v25  ;;  %468 = vmatprep.subr.bf16.mxu1 %v2066_v26  ;;  %v2705_v9 = vld [vmem:[#allocation10 + $0x68] ss:$16 sps:$4 sm:$0xff]   ;;  %v2708_v10 = vld [vmem:[#allocation10 + $0x4c] ss:$16 sps:$4 sm:$0xff]   ;;  %v606_v18 = vsub.s32 2, %v597_v17  ;;  %v598_v19 = vsub.s32 0, %v597_v17 }
  0x59   :  { %v2713_v11 = vld [vmem:[#allocation10 + $0x48] ss:$16 sps:$4 sm:$0xff]   ;;  %v2716_v12 = vld [vmem:[#allocation10 + $0x2c] ss:$16 sps:$4 sm:$0xff]   ;;  %v610_v20 = vsub.s32 3, %v597_v17  ;;  %v602_v25 = vsub.s32 1, %v597_v17 }
  0x5a   :  { %v2721_v13 = vld [vmem:[#allocation10 + $0x28] ss:$16 sps:$4 sm:$0xff]   ;;  %v2724_v14 = vld [vmem:[#allocation10 + $0xc] ss:$16 sps:$4 sm:$0xff]   ;;  %v2762_v24 = vrot.slane %v594_v22, %v606_v18  ;;  %s2532_s5 = smov [#allocation15]  }
  0x5b   :  { %396 = vmatpush1.bf16.msra.mxu0 %v2068_v27  ;;  %469 = vmatpush1.bf16.msra.mxu1 %v2069_v28  ;;  %v2729_v15 = vld [vmem:[#allocation10 + $0x8] ss:$16 sps:$4 sm:$0xff]   ;;  %v599_v28 = vrot.slane %v594_v22, %v598_v19  ;;  %s1844_s16 = sshll.u32 %s2532_s5, 4  ;;  %s1845_s16 = int_to_ptr.vmem [resolvable:$true] %s1844_s16 }
  0x5c   :  { %397 = vmatprep.subr.bf16.mxu0 %v2070_v29  ;;  %470 = vmatprep.subr.bf16.mxu1 %v2072_v30  ;;  %v2768_v29 = vrot.slane %v594_v22, %v610_v20  ;;  %s2428_s17 = scalar_lea.vmem %s1845_s16, 128  ;;  %p2433_p12 = scmp.lt.s32.totalorder %s1845_s16, %s1845_s16 }
  0x5d   :  { %p2429_p11 = scmp.ne.s32.totalorder %s1845_s16, %s2428_s17  ;;  %p2434_p13 = scmp.lt.s32.totalorder %s2428_s17, %s2428_s17 }
  0x5f   :  { %398 = vmatpush1.bf16.msra.mxu0 %v2074_v31  ;;  %471 = vmatpush1.bf16.msra.mxu1 %v2075_v32  ;;  %v603_v32 = vrot.slane %v594_v22, %v602_v25  ;;  %p2435_p0 = por %p2434_p13, %p2433_p12 }
  0x60   :  { %1986 = vmatprep.subr.bf16.mxu0 %v2077_v33  ;;  %891 = vmatprep.subr.bf16.mxu1 %v2605_v34 }
  0x61   :  { %p2436_p1 = pnand %p2435_p0, %p2429_p11 }
  0x62   :  { %416 = vmatmul.mubr.bf16.vlgmr.msra.gmra.mxu0 %v2607_v35  ;;  %489 = vmatmul.mubr.bf16.vlgmr.msra.gmra.mxu1 %v2607_v35 }
  0x63   :  { %1987 = vmatpush3.bf16.msra.mxu0 %v2077_v33  ;;  %892 = vmatpush1.bf16.msra.mxu1 %v2609_v36 }
  0x64   :  { %1988 = vmatprep.subr.bf16.mxu0 %v2081_v37  ;;  %893 = vmatprep.subr.bf16.mxu1 %v2612_v38 }
  0x65   :  { %425 = vmatprep.mubr.bf16.mxu0 %v3187_v0  ;;  %498 = vmatprep.mubr.bf16.mxu1 %v3187_v0 }
  0x67   :  { %1989 = vmatpush3.bf16.msra.mxu0 %v2081_v37  ;;  %894 = vmatpush1.bf16.msra.mxu1 %v2616_v39 }
  0x68   :  { %1990 = vmatprep.subr.bf16.mxu0 %v2086_v40  ;;  %895 = vmatprep.subr.bf16.mxu1 %v2620_v41 }
  0x6a   :  { %426 = vmatmul.mubr.bf16.gmra.mxu0 %v2624_v42  ;;  %499 = vmatmul.mubr.bf16.gmra.mxu1 %v2624_v42 }
  0x6b   :  { %1991 = vmatpush3.bf16.msra.mxu0 %v2086_v40  ;;  %896 = vmatpush1.bf16.msra.mxu1 %v2627_v43 }
  0x6c   :  { %1992 = vmatprep.subr.bf16.mxu0 %v2090_v44  ;;  %897 = vmatprep.subr.bf16.mxu1 %v2630_v45 }
  0x6d   :  { %435 = vmatprep.mubr.bf16.mxu0 %v3187_v0  ;;  %508 = vmatprep.mubr.bf16.mxu1 %v3187_v0 }
  0x6f   :  { %1993 = vmatpush3.bf16.msra.mxu0 %v2090_v44  ;;  %898 = vmatpush1.bf16.msra.mxu1 %v2635_v46 }
  0x70   :  { %1994 = vmatprep.subr.bf16.mxu0 %v2095_v47  ;;  %899 = vmatprep.subr.bf16.mxu1 %v2638_v48 }
  0x72   :  { %436 = vmatmul.mubr.bf16.gmra.mxu0 %v2094_v49  ;;  %509 = vmatmul.mubr.bf16.gmra.mxu1 %v2094_v49 }
  0x73   :  { %1995 = vmatpush3.bf16.msra.mxu0 %v2095_v47  ;;  %900 = vmatpush1.bf16.msra.mxu1 %v2643_v50 }
  0x74   :  { %1996 = vmatprep.subr.bf16.mxu0 %v2099_v51  ;;  %901 = vmatprep.subr.bf16.mxu1 %v2646_v52 }
  0x75   :  { %445 = vmatprep.mubr.bf16.mxu0 %v3187_v0  ;;  %518 = vmatprep.mubr.bf16.mxu1 %v3187_v0 }
  0x77   :  { %1997 = vmatpush3.bf16.msra.mxu0 %v2099_v51  ;;  %902 = vmatpush1.bf16.msra.mxu1 %v2649_v53 }
  0x78   :  { %1998 = vmatprep.subr.bf16.mxu0 %v2104_v54  ;;  %903 = vmatprep.subr.bf16.mxu1 %v2652_v55 }
  0x7a   :  { %446 = vmatmul.mubr.bf16.gmra.mxu0 %v2103_v56  ;;  %519 = vmatmul.mubr.bf16.gmra.mxu1 %v2103_v56 }
  0x7b   :  { %1999 = vmatpush3.bf16.msra.mxu0 %v2104_v54  ;;  %904 = vmatpush1.bf16.msra.mxu1 %v2657_v57 }
  0x7c   :  { %2000 = vmatprep.subr.bf16.mxu0 %v2108_v58  ;;  %905 = vmatprep.subr.bf16.mxu1 %v2660_v59 }
  0x7d   :  { %2002 = vmatprep.mubr.bf16.mxu0 %v2607_v35  ;;  %923 = vmatprep.mubr.bf16.mxu1 %v3187_v0 }
  0x7f   :  { %2001 = vmatpush3.bf16.msra.mxu0 %v2108_v58  ;;  %906 = vmatpush1.bf16.msra.mxu1 %v2663_v60 }
  0x80   :  { %932 = vmatprep.subr.bf16.mxu0 %v2666_v62  ;;  %1002 = vmatprep.subr.bf16.mxu1 %v2605_v34 }
  0x82   :  { %2003 = vmatmul.mubr.bf16.vlgmr.msra.gmra.mxu0 %v2624_v42  ;;  %924 = vmatmul.mubr.bf16.vlgmr.msra.gmra.mxu1 %v698_v63 }
  0x83   :  { %933 = vmatpush1.bf16.msra.mxu0 %v2671_v1  ;;  %2006 = vmatprep.mubr.bf16.mxu0 %v2094_v49 }
  0x84   :  { %934 = vmatprep.subr.bf16.mxu0 %v2674_v2  ;;  %1003 = vmatpush1.bf16.msra.mxu1 %v2609_v36 }
  0x85   :  { %1004 = vmatprep.subr.bf16.mxu1 %v2612_v38  ;;  %1034 = vmatprep.mubr.bf16.mxu1 %v3187_v0 }
  0x87   :  { %935 = vmatpush1.bf16.msra.mxu0 %v2679_v3 }
  0x88   :  { %936 = vmatprep.subr.bf16.mxu0 %v2682_v4  ;;  %1005 = vmatpush1.bf16.msra.mxu1 %v2616_v39 }
  0x89   :  { %1006 = vmatprep.subr.bf16.mxu1 %v2620_v41 }
  0x8a   :  { %2007 = vmatmul.mubr.bf16.gmra.mxu0 %v2103_v56 }
  0x8b   :  { %937 = vmatpush1.bf16.msra.mxu0 %v2688_v5  ;;  %964 = vmatprep.mubr.bf16.mxu0 %v3187_v0 }
  0x8c   :  { %938 = vmatprep.subr.bf16.mxu0 %v2691_v6  ;;  %1007 = vmatpush1.bf16.msra.mxu1 %v2627_v43 }
  0x8d   :  { %1008 = vmatprep.subr.bf16.mxu1 %v2630_v45 }
  0x8f   :  { %939 = vmatpush1.bf16.msra.mxu0 %v2696_v7 }
  0x90   :  { %940 = vmatprep.subr.bf16.mxu0 %v2700_v8  ;;  %1009 = vmatpush1.bf16.msra.mxu1 %v2635_v46 }
  0x91   :  { %1010 = vmatprep.subr.bf16.mxu1 %v2638_v48 }
  0x93   :  { %941 = vmatpush1.bf16.msra.mxu0 %v2705_v9 }
  0x94   :  { %942 = vmatprep.subr.bf16.mxu0 %v2708_v10  ;;  %1011 = vmatpush1.bf16.msra.mxu1 %v2643_v50 }
  0x95   :  { %1012 = vmatprep.subr.bf16.mxu1 %v2646_v52 }
  0x97   :  { %943 = vmatpush1.bf16.msra.mxu0 %v2713_v11 }
  0x98   :  { %944 = vmatprep.subr.bf16.mxu0 %v2716_v12  ;;  %1013 = vmatpush1.bf16.msra.mxu1 %v2649_v53 }
  0x99   :  { %1014 = vmatprep.subr.bf16.mxu1 %v2652_v55 }
  0x9b   :  { %945 = vmatpush1.bf16.msra.mxu0 %v2721_v13 }
  0x9c   :  { %946 = vmatprep.subr.bf16.mxu0 %v2724_v14  ;;  %1015 = vmatpush1.bf16.msra.mxu1 %v2657_v57 }
  0x9d   :  { %1016 = vmatprep.subr.bf16.mxu1 %v2660_v59 }
  0x9f   :  { %947 = vmatpush1.bf16.msra.mxu0 %v2729_v15 }
  0xa0   :  { %1043 = vmatprep.subr.bf16.mxu0 %v2666_v62  ;;  %1017 = vmatpush1.bf16.msra.mxu1 %v2663_v60 }
  0xa1   :  { %1113 = vmatprep.subr.bf16.mxu1 %v2605_v34 }
  0xa2   :  { %965 = vmatmul.mubr.bf16.vlgmr.msra.gmra.mxu0 %v698_v63 }
  0xa3   :  { %1044 = vmatpush1.bf16.msra.mxu0 %v2671_v1  ;;  %1075 = vmatprep.mubr.bf16.mxu0 %v3187_v0 }
  0xa4   :  { %1045 = vmatprep.subr.bf16.mxu0 %v2674_v2 }
  0xa7   :  { %1046 = vmatpush1.bf16.msra.mxu0 %v2679_v3 }
  0xa8   :  { %1047 = vmatprep.subr.bf16.mxu0 %v2682_v4 }
  0xab   :  { %1048 = vmatpush1.bf16.msra.mxu0 %v2688_v5 }
  0xac   :  { %1049 = vmatprep.subr.bf16.mxu0 %v2691_v6 }
  0xaf   :  { %1050 = vmatpush1.bf16.msra.mxu0 %v2696_v7 }
  0xb0   :  { %1051 = vmatprep.subr.bf16.mxu0 %v2700_v8 }
  0xb3   :  { %1052 = vmatpush1.bf16.msra.mxu0 %v2705_v9 }
  0xb4   :  { %1053 = vmatprep.subr.bf16.mxu0 %v2708_v10 }
  0xb7   :  { %1054 = vmatpush1.bf16.msra.mxu0 %v2713_v11 }
  0xb8   :  { %1055 = vmatprep.subr.bf16.mxu0 %v2716_v12 }
  0xbb   :  { %1056 = vmatpush1.bf16.msra.mxu0 %v2721_v13 }
  0xbc   :  { %1057 = vmatprep.subr.bf16.mxu0 %v2724_v14 }
  0xbf   :  { %1058 = vmatpush1.bf16.msra.mxu0 %v2729_v15 }
  0xc0   :  { %1154 = vmatprep.subr.bf16.mxu0 %v2666_v62 }
 0x122   :  { %v2755_v21 = vpop.f32.mrf.mxu0  ;;  %v2760_v23 = vpop.f32.mrf.mxu1 }
 0x124   :  { %v2764_v26 = vpop.f32.mrf.mxu0  ;;  %v2766_v27 = vpop.f32.mrf.mxu1 }
 0x126   :  { %v421_v30 = vpop.f32.mrf.mxu0  ;;  %v494_v31 = vpop.f32.mrf.mxu1 }
 0x127   :  { %v2770_v33 = vadd.f32 %v599_v28, %v421_v30  ;;  %v2773_v35 = vadd.f32 %v2762_v24, %v494_v31 }
 0x128   :  { %v423_v37 = vpop.f32.mrf.mxu0  ;;  %v496_v40 = vpop.f32.mrf.mxu1 }
 0x129   :  { %v2775_v42 = vadd.f32 %v603_v32, %v423_v37  ;;  %v2778_v44 = vadd.f32 %v2768_v29, %v496_v40 }
 0x12a   :  { %v427_v47 = vpop.f32.mrf.mxu0  ;;  %v500_v49 = vpop.f32.mrf.mxu1 }
 0x12b   :  { %v2780_v51 = vadd.f32 %v599_v28, %v427_v47  ;;  %v2783_v54 = vadd.f32 %v2762_v24, %v500_v49 }
 0x12c   :  { %v429_v56 = vpop.f32.mrf.mxu0  ;;  %v502_v58 = vpop.f32.mrf.mxu1 }
 0x12d   :  { %v2785_v61 = vadd.f32 %v603_v32, %v429_v56  ;;  %v2788_v63 = vadd.f32 %v2768_v29, %v502_v58 }
 0x12e   :  { %v431_v16 = vpop.f32.mrf.mxu0  ;;  %v504_v17 = vpop.f32.mrf.mxu1 }
 0x12f   :  { %v2790_v18 = vadd.f32 %v599_v28, %v431_v16  ;;  %v2793_v19 = vadd.f32 %v2762_v24, %v504_v17 }
 0x130   :  { %v433_v20 = vpop.f32.mrf.mxu0  ;;  %v506_v22 = vpop.f32.mrf.mxu1 }
 0x131   :  { %3189 = vst [vmem:[#allocation23_spill] sm:$0xff] %v2793_v19  ;;  %v2795_v25 = vadd.f32 %v603_v32, %v433_v20  ;;  %v2798_v30 = vadd.f32 %v2768_v29, %v506_v22 }
 0x132   :  { %v437_v31 = vpop.f32.mrf.mxu0  ;;  %v510_v37 = vpop.f32.mrf.mxu1 }
 0x133   :  { %3190 = vst [vmem:[#allocation24_spill] sm:$0xff] %v2795_v25  ;;  %3191 = vst [vmem:[#allocation25_spill] sm:$0xff] %v2798_v30  ;;  %v2800_v40 = vadd.f32 %v599_v28, %v437_v31  ;;  %v2803_v47 = vadd.f32 %v2762_v24, %v510_v37 }
 0x134   :  { %v439_v49 = vpop.f32.mrf.mxu0  ;;  %v512_v56 = vpop.f32.mrf.mxu1 }
 0x135   :  { %3192 = vst [vmem:[#allocation26_spill] sm:$0xff] %v2800_v40  ;;  %3193 = vst [vmem:[#allocation27_spill] sm:$0xff] %v2803_v47  ;;  %v2805_v58 = vadd.f32 %v603_v32, %v439_v49  ;;  %v2808_v16 = vadd.f32 %v2768_v29, %v512_v56 }
 0x136   :  { %v441_v17 = vpop.f32.mrf.mxu0  ;;  %v514_v20 = vpop.f32.mrf.mxu1 }
 0x137   :  { %3194 = vst [vmem:[#allocation28_spill] sm:$0xff] %v2805_v58  ;;  %3195 = vst [vmem:[#allocation29_spill] sm:$0xff] %v2808_v16  ;;  %v2810_v0 = vadd.f32 %v599_v28, %v441_v17  ;;  %v2813_v22 = vadd.f32 %v2762_v24, %v514_v20 }
 0x138   :  { %v443_v19 = vpop.f32.mrf.mxu0  ;;  %v516_v31 = vpop.f32.mrf.mxu1 }
 0x139   :  { %3196 = vst [vmem:[#allocation30_spill] sm:$0xff] %v2810_v0  ;;  %3197 = vst [vmem:[#allocation31_spill] sm:$0xff] %v2813_v22  ;;  %v2815_v40 = vadd.f32 %v603_v32, %v443_v19  ;;  %v2818_v37 = vadd.f32 %v2768_v29, %v516_v31 }
 0x13a   :  { %v447_v47 = vpop.f32.mrf.mxu0  ;;  %v520_v49 = vpop.f32.mrf.mxu1 }
 0x13b   :  { %3198 = vst [vmem:[#allocation32_spill] sm:$0xff] %v2815_v40  ;;  %3199 = vst [vmem:[#allocation33_spill] sm:$0xff] %v2818_v37  ;;  %v2820_v58 = vadd.f32 %v599_v28, %v447_v47  ;;  %v2823_v56 = vadd.f32 %v2762_v24, %v520_v49 }
 0x13c   :  { %v449_v16 = vpop.f32.mrf.mxu0  ;;  %v522_v17 = vpop.f32.mrf.mxu1 }
 0x13d   :  { %3200 = vst [vmem:[#allocation34_spill] sm:$0xff] %v2820_v58  ;;  %3201 = vst [vmem:[#allocation35_spill] sm:$0xff] %v2823_v56  ;;  %v2825_v0 = vadd.f32 %v603_v32, %v449_v16  ;;  %v2828_v20 = vadd.f32 %v2768_v29, %v522_v17  ;;  %v616_v17 = vadd.f32 %v599_v28, %v2755_v21 }
 0x13e   :  { %v451_v22 = vpop.f32.mrf.mxu0  ;;  %v524_v19 = vpop.f32.mrf.mxu1 }
 0x13f   :  { %3202 = vst [vmem:[#allocation36_spill] sm:$0xff] %v2825_v0  ;;  %3203 = vst [vmem:[#allocation37_spill] sm:$0xff] %v2828_v20  ;;  %v2830_v40 = vadd.f32 %v599_v28, %v451_v22  ;;  %v2833_v31 = vadd.f32 %v2762_v24, %v524_v19  ;;  %v617_v0 = vadd.f32 %v603_v32, %v2764_v26 }
 0x140   :  { %v453_v37 = vpop.f32.mrf.mxu0  ;;  %v526_v47 = vpop.f32.mrf.mxu1 }
 0x141   :  { %3204 = vst [vmem:[#allocation38_spill] sm:$0xff] %v2830_v40  ;;  %3205 = vst [vmem:[#allocation39_spill] sm:$0xff] %v2833_v31  ;;  %v2835_v58 = vadd.f32 %v603_v32, %v453_v37  ;;  %v2838_v49 = vadd.f32 %v2768_v29, %v526_v47 }
 0x142   :  { %v925_v56 = vpop.f32.mrf.mxu1  ;;  %v2842_v20 = vpop.f32.mrf.mxu0 }
 0x143   :  { %3206 = vst [vmem:[#allocation40_spill] sm:$0xff] %v2835_v58  ;;  %3207 = vst [vmem:[#allocation41_spill] sm:$0xff] %v2838_v49  ;;  %v973_v30 = vadd.f32 %v925_v56, %v616_v17 }
 0x144   :  { %v927_v16 = vpop.f32.mrf.mxu1  ;;  %v2844_v31 = vpop.f32.mrf.mxu0 }
 0x145   :  { %v974_v40 = vadd.f32 %v927_v16, %v617_v0  ;;  %v1950_v37 = vmul.f32 -1.442695, %v973_v30  ;;  %v618_v30 = vadd.f32 %v2762_v24, %v2760_v23 }
 0x146   :  { %v929_v22 = vpop.f32.mrf.mxu1  ;;  %v2846_v58 = vpop.f32.mrf.mxu0 }
 0x147   :  { %v1951_v25 = vmul.f32 -1.442695, %v974_v40  ;;  %3208 = vst [vmem:[#allocation42_spill] sm:$0xff] %v2846_v58 }
 0x148   :  { %v930_v19 = vpop.f32.mrf.mxu1  ;;  %v2848_v47 = vpop.f32.mrf.mxu0 }
 0x149   :  { %2136 = vpow2.f32 %v1951_v25  ;;  %3209 = vst [vmem:[#allocation43_spill] sm:$0xff] %v2848_v47  ;;  %v619_v25 = vadd.f32 %v2768_v29, %v2766_v27 }
 0x14a   :  { %2138 = vpow2.f32 %v1950_v37  ;;  %v2850_v49 = vpop.f32.mrf.mxu0 }
 0x14b   :  { %3210 = vst [vmem:[#allocation44_spill] sm:$0xff] %v2850_v49 }
 0x14c   :  { %v2852_v26 = vpop.f32.mrf.mxu0 }
 0x14d   :  { %3211 = vst [vmem:[#allocation45_spill] sm:$0xff] %v2852_v26 }
 0x14e   :  { %v2854_v28 = vpop.f32.mrf.mxu0 }
 0x14f   :  { %3212 = vst [vmem:[#allocation46_spill] sm:$0xff] %v2854_v28 }
 0x150   :  { %v2856_v16 = vpop.f32.mrf.mxu0 }
 0x151   :  { %3213 = vst [vmem:[#allocation47_spill] sm:$0xff] %v2856_v16 }
 0x156   :  { %v2137_v21 = vpop.eup %2136 }
 0x157   :  { %v2139_v0 = vpop.eup %2138  ;;  %v986_v32 = vadd.f32 1.0, %v2137_v21 }
 0x158   :  { %v980_v56 = vadd.f32 1.0, %v2139_v0  ;;  %v697_v0 = vld [vmem:[#allocation7] sm:$0xff] }
 0x159   :  { %2140 = vrcp.f32 %v986_v32 }
 0x15a   :  { %2142 = vrcp.f32 %v980_v56 }
 0x162   :  { %v966_v40 = vpop.f32.mrf.mxu0 }
 0x163   :  { %v975_v17 = vadd.f32 %v966_v40, %v618_v30 }
 0x164   :  { %v968_v22 = vpop.f32.mrf.mxu0 }
 0x165   :  { %2144 = vtanh.f32 %v975_v17  ;;  %v976_v19 = vadd.f32 %v968_v22, %v619_v25 }
 0x166   :  { %v970_v37 = vpop.f32.mrf.mxu0  ;;  %v2141_v21 = vpop.eup %2140 }
 0x167   :  { %v1952_v28 = vmul.f32 -1.442695, %v976_v19  ;;  %v2143_v16 = vpop.eup %2142  ;;  %v996_v47 = vmul.f32 %v2141_v21, %v697_v0 }
 0x168   :  { %v971_v26 = vpop.f32.mrf.mxu0 }
 0x169   :  { %2146 = vpow2.f32 %v1952_v28 }
 0x172   :  { %v2145_v49 = vpop.eup %2144 }
 0x173   :  { %v997_v23 = vmul.f32 %v2145_v49, %v2143_v16  ;;  %v3214_v49 = vmov 0  }
 0x175   :  { %v2862_v24 = vadd.f32 %v997_v23, %v996_v47 }
 0x176   :  { %v2147_v58 = vpop.eup %2146 }
 0x177   :  { %v993_v27 = vadd.f32 1.0, %v2147_v58  ;;  %2148 = vtanh.f32 %v2862_v24 }
 0x179   :  { %2150 = vrcp.f32 %v993_v27 }
 0x184   :  { %v2149_v29 = vpop.eup %2148 }
 0x186   :  { %v2151_v32 = vpop.eup %2150 }
 0x187   :  { %v1000_v56 = vmul.f32 %v2151_v32, %v2149_v29 }
 0x189   :  { %v1001_v30 = vpack.c.bf16 %v1000_v56, %v1000_v56  ;;  %1778 = vst [vmem:[#allocation12] sm:$0xff] %v1000_v56 }
 0x18b   :  { %1035 = vmatmul.mubr.bf16.vlgmr.msra.gmra.mxu1 %v1001_v30  ;;  %1076 = vmatmul.mubr.bf16.vlgmr.msra.gmra.mxu0 %v1001_v30 }
 0x18c   :  { %1114 = vmatpush1.bf16.msra.mxu1 %v2609_v36  ;;  %1155 = vmatpush1.bf16.msra.mxu0 %v2671_v1 }
 0x18d   :  { %1115 = vmatprep.subr.bf16.mxu1 %v2612_v38  ;;  %1156 = vmatprep.subr.bf16.mxu0 %v2674_v2 }
 0x18e   :  { %1145 = vmatprep.mubr.bf16.mxu1 %v3214_v49  ;;  %1186 = vmatprep.mubr.bf16.mxu0 %v3214_v49 }
 0x190   :  { %1116 = vmatpush1.bf16.msra.mxu1 %v2616_v39  ;;  %1157 = vmatpush1.bf16.msra.mxu0 %v2679_v3 }
 0x191   :  { %1117 = vmatprep.subr.bf16.mxu1 %v2620_v41  ;;  %1158 = vmatprep.subr.bf16.mxu0 %v2682_v4 }
 0x194   :  { %1118 = vmatpush1.bf16.msra.mxu1 %v2627_v43  ;;  %1159 = vmatpush1.bf16.msra.mxu0 %v2688_v5 }
 0x195   :  { %1119 = vmatprep.subr.bf16.mxu1 %v2630_v45  ;;  %1160 = vmatprep.subr.bf16.mxu0 %v2691_v6 }
 0x198   :  { %1120 = vmatpush1.bf16.msra.mxu1 %v2635_v46  ;;  %1161 = vmatpush1.bf16.msra.mxu0 %v2696_v7 }
 0x199   :  { %1121 = vmatprep.subr.bf16.mxu1 %v2638_v48  ;;  %1162 = vmatprep.subr.bf16.mxu0 %v2700_v8 }
 0x19c   :  { %1122 = vmatpush1.bf16.msra.mxu1 %v2643_v50  ;;  %1163 = vmatpush1.bf16.msra.mxu0 %v2705_v9 }
 0x19d   :  { %1123 = vmatprep.subr.bf16.mxu1 %v2646_v52  ;;  %1164 = vmatprep.subr.bf16.mxu0 %v2708_v10 }
 0x1a0   :  { %1124 = vmatpush1.bf16.msra.mxu1 %v2649_v53  ;;  %1165 = vmatpush1.bf16.msra.mxu0 %v2713_v11 }
 0x1a1   :  { %1125 = vmatprep.subr.bf16.mxu1 %v2652_v55  ;;  %1166 = vmatprep.subr.bf16.mxu0 %v2716_v12 }
 0x1a4   :  { %1126 = vmatpush1.bf16.msra.mxu1 %v2657_v57  ;;  %1167 = vmatpush1.bf16.msra.mxu0 %v2721_v13 }
 0x1a5   :  { %1127 = vmatprep.subr.bf16.mxu1 %v2660_v59  ;;  %1168 = vmatprep.subr.bf16.mxu0 %v2724_v14 }
 0x1a8   :  { %1128 = vmatpush1.bf16.msra.mxu1 %v2663_v60  ;;  %1169 = vmatpush1.bf16.msra.mxu0 %v2729_v15 }
 0x1a9   :  { %1224 = vmatprep.subr.bf16.mxu1 %v2605_v34  ;;  %1265 = vmatprep.subr.bf16.mxu0 %v2666_v62 }
 0x24b   :  { %v1036_v58 = vpop.f32.mrf.mxu1  ;;  %v1077_v47 = vpop.f32.mrf.mxu0 }
 0x24c   :  { %v1084_v26 = vadd.f32 %v1036_v58, %v2770_v33  ;;  %v1086_v23 = vadd.f32 %v1077_v47, %v2773_v35 }
 0x24d   :  { %v1038_v28 = vpop.f32.mrf.mxu1  ;;  %v1079_v16 = vpop.f32.mrf.mxu0 }
 0x24e   :  { %v1953_v40 = vmul.f32 -1.442695, %v1084_v26  ;;  %v1085_v25 = vadd.f32 %v1038_v28, %v2775_v42  ;;  %v1087_v0 = vadd.f32 %v1079_v16, %v2778_v44 }
 0x24f   :  { %v1040_v17 = vpop.f32.mrf.mxu1  ;;  %v1081_v22 = vpop.f32.mrf.mxu0 }
 0x250   :  { %2152 = vpow2.f32 %v1953_v40  ;;  %v1954_v19 = vmul.f32 -1.442695, %v1085_v25  ;;  %v1955_v27 = vmul.f32 -1.442695, %v1087_v0 }
 0x251   :  { %v1041_v37 = vpop.f32.mrf.mxu1  ;;  %v1082_v21 = vpop.f32.mrf.mxu0 }
 0x252   :  { %2154 = vpow2.f32 %v1954_v19 }
 0x253   :  { %2156 = vtanh.f32 %v1086_v23 }
 0x254   :  { %2158 = vpow2.f32 %v1955_v27 }
 0x25d   :  { %v2153_v29 = vpop.eup %2152 }
 0x25e   :  { %v1091_v32 = vadd.f32 1.0, %v2153_v29 }
 0x25f   :  { %v2155_v33 = vpop.eup %2154 }
 0x260   :  { %2160 = vrcp.f32 %v1091_v32  ;;  %v1097_v56 = vadd.f32 1.0, %v2155_v33  ;;  %v2157_v42 = vpop.eup %2156 }
 0x261   :  { %v2159_v30 = vpop.eup %2158 }
 0x262   :  { %2162 = vrcp.f32 %v1097_v56  ;;  %v1104_v40 = vadd.f32 1.0, %v2159_v30 }
 0x264   :  { %2164 = vrcp.f32 %v1104_v40 }
 0x26d   :  { %v2161_v58 = vpop.eup %2160 }
 0x26e   :  { %v1108_v26 = vmul.f32 %v2161_v58, %v2157_v42 }
 0x26f   :  { %v2163_v28 = vpop.eup %2162 }
 0x270   :  { %v1107_v25 = vmul.f32 %v2163_v28, %v2862_v24 }
 0x271   :  { %v2165_v35 = vpop.eup %2164 }
 0x272   :  { %v2904_v44 = vadd.f32 %v1108_v26, %v1107_v25 }
 0x274   :  { %2166 = vtanh.f32 %v2904_v44 }
 0x281   :  { %v2167_v47 = vpop.eup %2166 }
 0x282   :  { %v1111_v16 = vmul.f32 %v2167_v47, %v2165_v35 }
 0x284   :  { %v1112_v17 = vpack.c.bf16 %v1111_v16, %v1111_v16  ;;  %1779 = vst [vmem:[#allocation12 + $0x8] sm:$0xff] %v1111_v16 }
 0x286   :  { %1146 = vmatmul.mubr.bf16.vlgmr.msra.gmra.mxu1 %v1112_v17  ;;  %1187 = vmatmul.mubr.bf16.vlgmr.msra.gmra.mxu0 %v1112_v17 }
 0x287   :  { %1225 = vmatpush1.bf16.msra.mxu1 %v2609_v36  ;;  %1266 = vmatpush1.bf16.msra.mxu0 %v2671_v1 }
 0x288   :  { %1226 = vmatprep.subr.bf16.mxu1 %v2612_v38  ;;  %1267 = vmatprep.subr.bf16.mxu0 %v2674_v2 }
 0x289   :  { %1256 = vmatprep.mubr.bf16.mxu1 %v3214_v49  ;;  %1297 = vmatprep.mubr.bf16.mxu0 %v3214_v49 }
 0x28b   :  { %1227 = vmatpush1.bf16.msra.mxu1 %v2616_v39  ;;  %1268 = vmatpush1.bf16.msra.mxu0 %v2679_v3 }
 0x28c   :  { %1228 = vmatprep.subr.bf16.mxu1 %v2620_v41  ;;  %1269 = vmatprep.subr.bf16.mxu0 %v2682_v4 }
 0x28f   :  { %1229 = vmatpush1.bf16.msra.mxu1 %v2627_v43  ;;  %1270 = vmatpush1.bf16.msra.mxu0 %v2688_v5 }
 0x290   :  { %1230 = vmatprep.subr.bf16.mxu1 %v2630_v45  ;;  %1271 = vmatprep.subr.bf16.mxu0 %v2691_v6 }
 0x293   :  { %1231 = vmatpush1.bf16.msra.mxu1 %v2635_v46  ;;  %1272 = vmatpush1.bf16.msra.mxu0 %v2696_v7 }
 0x294   :  { %1232 = vmatprep.subr.bf16.mxu1 %v2638_v48  ;;  %1273 = vmatprep.subr.bf16.mxu0 %v2700_v8 }
 0x297   :  { %1233 = vmatpush1.bf16.msra.mxu1 %v2643_v50  ;;  %1274 = vmatpush1.bf16.msra.mxu0 %v2705_v9 }
 0x298   :  { %1234 = vmatprep.subr.bf16.mxu1 %v2646_v52  ;;  %1275 = vmatprep.subr.bf16.mxu0 %v2708_v10 }
 0x29b   :  { %1235 = vmatpush1.bf16.msra.mxu1 %v2649_v53  ;;  %1276 = vmatpush1.bf16.msra.mxu0 %v2713_v11 }
 0x29c   :  { %1236 = vmatprep.subr.bf16.mxu1 %v2652_v55  ;;  %1277 = vmatprep.subr.bf16.mxu0 %v2716_v12 }
 0x29f   :  { %1237 = vmatpush1.bf16.msra.mxu1 %v2657_v57  ;;  %1278 = vmatpush1.bf16.msra.mxu0 %v2721_v13 }
 0x2a0   :  { %1238 = vmatprep.subr.bf16.mxu1 %v2660_v59  ;;  %1279 = vmatprep.subr.bf16.mxu0 %v2724_v14 }
 0x2a3   :  { %1239 = vmatpush1.bf16.msra.mxu1 %v2663_v60  ;;  %1280 = vmatpush1.bf16.msra.mxu0 %v2729_v15 }
 0x2a4   :  { %1335 = vmatprep.subr.bf16.mxu1 %v2605_v34  ;;  %1376 = vmatprep.subr.bf16.mxu0 %v2666_v62 }
 0x346   :  { %v1147_v24 = vpop.f32.mrf.mxu1  ;;  %v1188_v22 = vpop.f32.mrf.mxu0 }
 0x347   :  { %v1195_v19 = vadd.f32 %v1147_v24, %v2780_v51  ;;  %v1197_v30 = vadd.f32 %v1188_v22, %v2783_v54 }
 0x348   :  { %v1149_v37 = vpop.f32.mrf.mxu1  ;;  %v1190_v21 = vpop.f32.mrf.mxu0 }
 0x349   :  { %v1956_v0 = vmul.f32 -1.442695, %v1195_v19  ;;  %v1196_v23 = vadd.f32 %v1149_v37, %v2785_v61  ;;  %v1198_v42 = vadd.f32 %v1190_v21, %v2788_v63 }
 0x34a   :  { %v1151_v27 = vpop.f32.mrf.mxu1  ;;  %v1192_v29 = vpop.f32.mrf.mxu0 }
 0x34b   :  { %2168 = vpow2.f32 %v1956_v0  ;;  %v1957_v32 = vmul.f32 -1.442695, %v1196_v23  ;;  %v1958_v58 = vmul.f32 -1.442695, %v1198_v42 }
 0x34c   :  { %v1152_v33 = vpop.f32.mrf.mxu1  ;;  %v1193_v56 = vpop.f32.mrf.mxu0 }
 0x34d   :  { %2170 = vpow2.f32 %v1957_v32  ;;  %v3216_v33 = vld [vmem:[#allocation25_spill] sm:$0xff]  ;;  %v3217_v56 = vld [vmem:[#allocation23_spill] sm:$0xff] }
 0x34e   :  { %2172 = vtanh.f32 %v1197_v30 }
 0x34f   :  { %2174 = vpow2.f32 %v1958_v58 }
 0x358   :  { %v2169_v26 = vpop.eup %2168 }
 0x359   :  { %v1202_v28 = vadd.f32 1.0, %v2169_v26 }
 0x35a   :  { %v2171_v51 = vpop.eup %2170 }
 0x35b   :  { %2176 = vrcp.f32 %v1202_v28  ;;  %v1208_v40 = vadd.f32 1.0, %v2171_v51  ;;  %v2173_v61 = vpop.eup %2172 }
 0x35c   :  { %v2175_v25 = vpop.eup %2174 }
 0x35d   :  { %2178 = vrcp.f32 %v1208_v40  ;;  %v1215_v17 = vadd.f32 1.0, %v2175_v25 }
 0x35f   :  { %2180 = vrcp.f32 %v1215_v17 }
 0x368   :  { %v2177_v35 = vpop.eup %2176 }
 0x369   :  { %v1219_v47 = vmul.f32 %v2177_v35, %v2173_v61 }
 0x36a   :  { %v2179_v16 = vpop.eup %2178 }
 0x36b   :  { %v1218_v24 = vmul.f32 %v2179_v16, %v2904_v44  ;;  %v3215_v44 = vld [vmem:[#allocation24_spill] sm:$0xff] }
 0x36c   :  { %v2181_v54 = vpop.eup %2180 }
 0x36d   :  { %v2946_v63 = vadd.f32 %v1219_v47, %v1218_v24 }
 0x36f   :  { %2182 = vtanh.f32 %v2946_v63 }
 0x37c   :  { %v2183_v22 = vpop.eup %2182 }
 0x37d   :  { %v1222_v19 = vmul.f32 %v2183_v22, %v2181_v54 }
 0x37f   :  { %v1223_v37 = vpack.c.bf16 %v1222_v19, %v1222_v19  ;;  %1780 = vst [vmem:[#allocation12 + $0x10] sm:$0xff] %v1222_v19 }
 0x381   :  { %1257 = vmatmul.mubr.bf16.vlgmr.msra.gmra.mxu1 %v1223_v37  ;;  %1298 = vmatmul.mubr.bf16.vlgmr.msra.gmra.mxu0 %v1223_v37  ;;  %v2991_v37 = vld [vmem:[#allocation10 + $0xe0] ss:$16 sps:$4 sm:$0xff]  }
 0x382   :  { %1336 = vmatpush1.bf16.msra.mxu1 %v2609_v36  ;;  %1377 = vmatpush1.bf16.msra.mxu0 %v2671_v1 }
 0x383   :  { %1337 = vmatprep.subr.bf16.mxu1 %v2612_v38  ;;  %1378 = vmatprep.subr.bf16.mxu0 %v2674_v2 }
 0x384   :  { %1367 = vmatprep.mubr.bf16.mxu1 %v3214_v49  ;;  %1408 = vmatprep.mubr.bf16.mxu0 %v3214_v49 }
 0x386   :  { %1338 = vmatpush1.bf16.msra.mxu1 %v2616_v39  ;;  %1379 = vmatpush1.bf16.msra.mxu0 %v2679_v3 }
 0x387   :  { %1339 = vmatprep.subr.bf16.mxu1 %v2620_v41  ;;  %1380 = vmatprep.subr.bf16.mxu0 %v2682_v4 }
 0x38a   :  { %1340 = vmatpush1.bf16.msra.mxu1 %v2627_v43  ;;  %1381 = vmatpush1.bf16.msra.mxu0 %v2688_v5 }
 0x38b   :  { %1341 = vmatprep.subr.bf16.mxu1 %v2630_v45  ;;  %1382 = vmatprep.subr.bf16.mxu0 %v2691_v6 }
 0x38e   :  { %1342 = vmatpush1.bf16.msra.mxu1 %v2635_v46  ;;  %1383 = vmatpush1.bf16.msra.mxu0 %v2696_v7 }
 0x38f   :  { %1343 = vmatprep.subr.bf16.mxu1 %v2638_v48  ;;  %1384 = vmatprep.subr.bf16.mxu0 %v2700_v8 }
 0x392   :  { %1344 = vmatpush1.bf16.msra.mxu1 %v2643_v50  ;;  %1385 = vmatpush1.bf16.msra.mxu0 %v2705_v9 }
 0x393   :  { %1345 = vmatprep.subr.bf16.mxu1 %v2646_v52  ;;  %1386 = vmatprep.subr.bf16.mxu0 %v2708_v10 }
 0x396   :  { %1346 = vmatpush1.bf16.msra.mxu1 %v2649_v53  ;;  %1387 = vmatpush1.bf16.msra.mxu0 %v2713_v11 }
 0x397   :  { %1347 = vmatprep.subr.bf16.mxu1 %v2652_v55  ;;  %1388 = vmatprep.subr.bf16.mxu0 %v2716_v12 }
 0x39a   :  { %1348 = vmatpush1.bf16.msra.mxu1 %v2657_v57  ;;  %1389 = vmatpush1.bf16.msra.mxu0 %v2721_v13 }
 0x39b   :  { %1349 = vmatprep.subr.bf16.mxu1 %v2660_v59  ;;  %1390 = vmatprep.subr.bf16.mxu0 %v2724_v14 }
 0x39e   :  { %1350 = vmatpush1.bf16.msra.mxu1 %v2663_v60  ;;  %1391 = vmatpush1.bf16.msra.mxu0 %v2729_v15 }
 0x39f   :  { %1446 = vmatprep.subr.bf16.mxu1 %v2605_v34  ;;  %1487 = vmatprep.subr.bf16.mxu0 %v2666_v62 }
 0x441   :  { %v1258_v36 = vpop.f32.mrf.mxu1  ;;  %v1299_v38 = vpop.f32.mrf.mxu0 }
 0x442   :  { %v1306_v39 = vadd.f32 %v1258_v36, %v2790_v18  ;;  %v1308_v42 = vadd.f32 %v1299_v38, %v3217_v56  ;;  %v2995_v36 = vld [vmem:[#allocation10 + $0xc4] ss:$16 sps:$4 sm:$0xff]  }
 0x443   :  { %v1260_v41 = vpop.f32.mrf.mxu1  ;;  %v1301_v43 = vpop.f32.mrf.mxu0  ;;  %v3005_v38 = vld [vmem:[#allocation10 + $0xa4] ss:$16 sps:$4 sm:$0xff]  }
 0x444   :  { %v1959_v45 = vmul.f32 -1.442695, %v1306_v39  ;;  %v1307_v21 = vadd.f32 %v1260_v41, %v3215_v44  ;;  %v1309_v34 = vadd.f32 %v1301_v43, %v3216_v33  ;;  %v3009_v39 = vld [vmem:[#allocation10 + $0xa0] ss:$16 sps:$4 sm:$0xff]   ;;  %v3013_v41 = vld [vmem:[#allocation10 + $0x84] ss:$16 sps:$4 sm:$0xff]  }
 0x445   :  { %v1262_v0 = vpop.f32.mrf.mxu1  ;;  %v1303_v23 = vpop.f32.mrf.mxu0 }
 0x446   :  { %2184 = vpow2.f32 %v1959_v45  ;;  %v1960_v27 = vmul.f32 -1.442695, %v1307_v21  ;;  %v1961_v30 = vmul.f32 -1.442695, %v1309_v34 }
 0x447   :  { %v1263_v29 = vpop.f32.mrf.mxu1  ;;  %v1304_v32 = vpop.f32.mrf.mxu0 }
 0x448   :  { %2186 = vpow2.f32 %v1960_v27  ;;  %v3220_v27 = vld [vmem:[#allocation29_spill] sm:$0xff]  ;;  %v3221_v32 = vld [vmem:[#allocation27_spill] sm:$0xff] }
 0x449   :  { %2188 = vtanh.f32 %v1308_v42 }
 0x44a   :  { %2190 = vpow2.f32 %v1961_v30 }
 0x453   :  { %v2185_v58 = vpop.eup %2184 }
 0x454   :  { %v1313_v26 = vadd.f32 1.0, %v2185_v58 }
 0x455   :  { %v2187_v18 = vpop.eup %2186 }
 0x456   :  { %2192 = vrcp.f32 %v1313_v26  ;;  %v1319_v28 = vadd.f32 1.0, %v2187_v18  ;;  %v2189_v51 = vpop.eup %2188 }
 0x457   :  { %v2191_v40 = vpop.eup %2190 }
 0x458   :  { %2194 = vrcp.f32 %v1319_v28  ;;  %v1326_v47 = vadd.f32 1.0, %v2191_v40 }
 0x45a   :  { %2196 = vrcp.f32 %v1326_v47 }
 0x463   :  { %v2193_v61 = vpop.eup %2192 }
 0x464   :  { %v1330_v25 = vmul.f32 %v2193_v61, %v2189_v51 }
 0x465   :  { %v2195_v35 = vpop.eup %2194 }
 0x466   :  { %v1329_v16 = vmul.f32 %v2195_v35, %v2946_v63  ;;  %v3001_v63 = vld [vmem:[#allocation10 + $0xc0] ss:$16 sps:$4 sm:$0xff]  }
 0x467   :  { %v2197_v24 = vpop.eup %2196 }
 0x468   :  { %v2988_v17 = vadd.f32 %v1330_v25, %v1329_v16 }
 0x46a   :  { %2198 = vtanh.f32 %v2988_v17 }
 0x477   :  { %v2199_v54 = vpop.eup %2198 }
 0x478   :  { %v1333_v22 = vmul.f32 %v2199_v54, %v2197_v24 }
 0x47a   :  { %v1334_v19 = vpack.c.bf16 %v1333_v22, %v1333_v22  ;;  %1781 = vst [vmem:[#allocation12 + $0x18] sm:$0xff] %v1333_v22 }
 0x47c   :  { %1368 = vmatmul.mubr.bf16.vlgmr.msra.gmra.mxu1 %v1334_v19  ;;  %1409 = vmatmul.mubr.bf16.vlgmr.msra.gmra.mxu0 %v1334_v19 }
 0x47d   :  { %1447 = vmatpush1.bf16.msra.mxu1 %v2991_v37  ;;  %1488 = vmatpush1.bf16.msra.mxu0 %v2671_v1 }
 0x47e   :  { %1448 = vmatprep.subr.bf16.mxu1 %v2995_v36  ;;  %1489 = vmatprep.subr.bf16.mxu0 %v2674_v2 }
 0x47f   :  { %1478 = vmatprep.mubr.bf16.mxu1 %v3214_v49  ;;  %1519 = vmatprep.mubr.bf16.mxu0 %v3214_v49 }
 0x481   :  { %1449 = vmatpush1.bf16.msra.mxu1 %v3001_v63  ;;  %1490 = vmatpush1.bf16.msra.mxu0 %v2679_v3 }
 0x482   :  { %1450 = vmatprep.subr.bf16.mxu1 %v3005_v38  ;;  %1491 = vmatprep.subr.bf16.mxu0 %v2682_v4 }
 0x485   :  { %1451 = vmatpush1.bf16.msra.mxu1 %v3009_v39  ;;  %1492 = vmatpush1.bf16.msra.mxu0 %v2688_v5 }
 0x486   :  { %1452 = vmatprep.subr.bf16.mxu1 %v3013_v41  ;;  %1493 = vmatprep.subr.bf16.mxu0 %v2691_v6 }
 0x489   :  { %1453 = vmatpush1.bf16.msra.mxu1 %v2635_v46  ;;  %1494 = vmatpush1.bf16.msra.mxu0 %v2696_v7  ;;  %v3035_v46 = vld [vmem:[#allocation10 + $0xe4] ss:$16 sps:$4 sm:$0xff]  }
 0x48a   :  { %1454 = vmatprep.subr.bf16.mxu1 %v2638_v48  ;;  %1495 = vmatprep.subr.bf16.mxu0 %v2700_v8 }
 0x48d   :  { %1455 = vmatpush1.bf16.msra.mxu1 %v2643_v50  ;;  %1496 = vmatpush1.bf16.msra.mxu0 %v2705_v9 }
 0x48e   :  { %1456 = vmatprep.subr.bf16.mxu1 %v2646_v52  ;;  %1497 = vmatprep.subr.bf16.mxu0 %v2708_v10  ;;  %v3218_v52 = vld [vmem:[#allocation26_spill] sm:$0xff] }
 0x491   :  { %1457 = vmatpush1.bf16.msra.mxu1 %v2649_v53  ;;  %1498 = vmatpush1.bf16.msra.mxu0 %v2713_v11 }
 0x492   :  { %1458 = vmatprep.subr.bf16.mxu1 %v2652_v55  ;;  %1499 = vmatprep.subr.bf16.mxu0 %v2716_v12 }
 0x495   :  { %1459 = vmatpush1.bf16.msra.mxu1 %v2657_v57  ;;  %1500 = vmatpush1.bf16.msra.mxu0 %v2721_v13 }
 0x496   :  { %1460 = vmatprep.subr.bf16.mxu1 %v2660_v59  ;;  %1501 = vmatprep.subr.bf16.mxu0 %v2724_v14  ;;  %v3219_v59 = vld [vmem:[#allocation28_spill] sm:$0xff] }
 0x499   :  { %1461 = vmatpush1.bf16.msra.mxu1 %v2663_v60  ;;  %1502 = vmatpush1.bf16.msra.mxu0 %v2729_v15 }
 0x49a   :  { %1557 = vmatprep.subr.bf16.mxu1 %v3035_v46  ;;  %1598 = vmatprep.subr.bf16.mxu0 %v2666_v62 }
 0x53c   :  { %v1369_v48 = vpop.f32.mrf.mxu1  ;;  %v1410_v50 = vpop.f32.mrf.mxu0 }
 0x53d   :  { %v1417_v53 = vadd.f32 %v1369_v48, %v3218_v52  ;;  %v1419_v62 = vadd.f32 %v1410_v50, %v3221_v32  ;;  %v3223_v48 = vld [vmem:[#allocation32_spill] sm:$0xff] }
 0x53e   :  { %v1371_v55 = vpop.f32.mrf.mxu1  ;;  %v1412_v57 = vpop.f32.mrf.mxu0 }
 0x53f   :  { %v1962_v43 = vmul.f32 -1.442695, %v1417_v53  ;;  %v1418_v45 = vadd.f32 %v1371_v55, %v3219_v59  ;;  %v1420_v29 = vadd.f32 %v1412_v57, %v3220_v27 }
 0x540   :  { %v1373_v44 = vpop.f32.mrf.mxu1  ;;  %v1414_v21 = vpop.f32.mrf.mxu0 }
 0x541   :  { %2200 = vpow2.f32 %v1962_v43  ;;  %v1963_v60 = vmul.f32 -1.442695, %v1418_v45  ;;  %v1964_v33 = vmul.f32 -1.442695, %v1420_v29  ;;  %v3225_v43 = vld [vmem:[#allocation31_spill] sm:$0xff] }
 0x542   :  { %v1374_v0 = vpop.f32.mrf.mxu1  ;;  %v1415_v23 = vpop.f32.mrf.mxu0 }
 0x543   :  { %2202 = vpow2.f32 %v1963_v60 }
 0x544   :  { %2204 = vtanh.f32 %v1419_v62 }
 0x545   :  { %2206 = vpow2.f32 %v1964_v33 }
 0x54e   :  { %v2201_v34 = vpop.eup %2200 }
 0x54f   :  { %v1424_v56 = vadd.f32 1.0, %v2201_v34 }
 0x550   :  { %v2203_v42 = vpop.eup %2202 }
 0x551   :  { %2208 = vrcp.f32 %v1424_v56  ;;  %v1430_v30 = vadd.f32 1.0, %v2203_v42  ;;  %v2205_v58 = vpop.eup %2204 }
 0x552   :  { %v2207_v26 = vpop.eup %2206 }
 0x553   :  { %2210 = vrcp.f32 %v1430_v30  ;;  %v1437_v40 = vadd.f32 1.0, %v2207_v26 }
 0x555   :  { %2212 = vrcp.f32 %v1437_v40  ;;  %v2316_v40 = vld [vmem:[#allocation10 + $0xac] ss:$16 sps:$4 sm:$0xff]  }
 0x55e   :  { %v2209_v18 = vpop.eup %2208 }
 0x55f   :  { %v1441_v28 = vmul.f32 %v2209_v18, %v2205_v58  ;;  %v2313_v18 = vld [vmem:[#allocation10 + $0xe8] ss:$16 sps:$4 sm:$0xff]  }
 0x560   :  { %v2211_v51 = vpop.eup %2210 }
 0x561   :  { %v1440_v61 = vmul.f32 %v2211_v51, %v2988_v17  ;;  %v3222_v17 = vld [vmem:[#allocation30_spill] sm:$0xff] }
 0x562   :  { %v2213_v35 = vpop.eup %2212  ;;  %v2315_v51 = vld [vmem:[#allocation10 + $0xc8] ss:$16 sps:$4 sm:$0xff]  }
 0x563   :  { %v3044_v25 = vadd.f32 %v1441_v28, %v1440_v61  ;;  %v2314_v28 = vld [vmem:[#allocation10 + $0xcc] ss:$16 sps:$4 sm:$0xff]   ;;  %v2319_v61 = vld [vmem:[#allocation10 + $0x88] ss:$16 sps:$4 sm:$0xff]  }
 0x565   :  { %2214 = vtanh.f32 %v3044_v25 }
 0x572   :  { %v2215_v47 = vpop.eup %2214 }
 0x573   :  { %v1444_v16 = vmul.f32 %v2215_v47, %v2213_v35  ;;  %v2326_v35 = vld [vmem:[#allocation10 + $0xc] ss:$16 sps:$4 sm:$0xff]   ;;  %v2327_v47 = vld [vmem:[#allocation10 + $0x8] ss:$16 sps:$4 sm:$0xff]  }
 0x575   :  { %v1445_v24 = vpack.c.bf16 %v1444_v16, %v1444_v16  ;;  %1782 = vst [vmem:[#allocation12 + $0x20] sm:$0xff] %v1444_v16 }
 0x577   :  { %1479 = vmatmul.mubr.bf16.vlgmr.msra.gmra.mxu1 %v1445_v24  ;;  %1520 = vmatmul.mubr.bf16.vlgmr.msra.gmra.mxu0 %v1445_v24 }
 0x578   :  { %1558 = vmatpush1.bf16.msra.mxu1 %v2991_v37  ;;  %1599 = vmatpush1.bf16.msra.mxu0 %v2671_v1  ;;  %v3061_v1 = vld [vmem:[#allocation10 + $0x80] ss:$16 sps:$4 sm:$0xff]  }
 0x579   :  { %1559 = vmatprep.subr.bf16.mxu1 %v2995_v36  ;;  %1600 = vmatprep.subr.bf16.mxu0 %v2674_v2  ;;  %v3065_v2 = vld [vmem:[#allocation10 + $0x64] ss:$16 sps:$4 sm:$0xff]  }
 0x57a   :  { %1589 = vmatprep.mubr.bf16.mxu1 %v3214_v49  ;;  %1630 = vmatprep.mubr.bf16.mxu0 %v3214_v49 }
 0x57c   :  { %1560 = vmatpush1.bf16.msra.mxu1 %v3001_v63  ;;  %1601 = vmatpush1.bf16.msra.mxu0 %v2679_v3  ;;  %v3069_v3 = vld [vmem:[#allocation10 + $0x60] ss:$16 sps:$4 sm:$0xff]  }
 0x57d   :  { %1561 = vmatprep.subr.bf16.mxu1 %v3005_v38  ;;  %1602 = vmatprep.subr.bf16.mxu0 %v2682_v4  ;;  %v3073_v4 = vld [vmem:[#allocation10 + $0x44] ss:$16 sps:$4 sm:$0xff]  }
 0x580   :  { %1562 = vmatpush1.bf16.msra.mxu1 %v3009_v39  ;;  %1603 = vmatpush1.bf16.msra.mxu0 %v2688_v5  ;;  %v3077_v5 = vld [vmem:[#allocation10 + $0x40] ss:$16 sps:$4 sm:$0xff]  }
 0x581   :  { %1563 = vmatprep.subr.bf16.mxu1 %v3013_v41  ;;  %1604 = vmatprep.subr.bf16.mxu0 %v2691_v6  ;;  %v3081_v6 = vld [vmem:[#allocation10 + $0x24] ss:$16 sps:$4 sm:$0xff]  }
 0x584   :  { %1564 = vmatpush1.bf16.msra.mxu1 %v3061_v1  ;;  %1605 = vmatpush1.bf16.msra.mxu0 %v2696_v7  ;;  %v3085_v7 = vld [vmem:[#allocation10 + $0x20] ss:$16 sps:$4 sm:$0xff]  }
 0x585   :  { %1565 = vmatprep.subr.bf16.mxu1 %v3065_v2  ;;  %1606 = vmatprep.subr.bf16.mxu0 %v2700_v8  ;;  %v3089_v8 = vld [vmem:[#allocation10 + $0x4] ss:$16 sps:$4 sm:$0xff]  }
 0x588   :  { %1566 = vmatpush1.bf16.msra.mxu1 %v3069_v3  ;;  %1607 = vmatpush1.bf16.msra.mxu0 %v2705_v9  ;;  %v3093_v9 = vld [vmem:[#allocation10] ss:$16 sps:$4 sm:$0xff]  }
 0x589   :  { %1567 = vmatprep.subr.bf16.mxu1 %v3073_v4  ;;  %1608 = vmatprep.subr.bf16.mxu0 %v2708_v10  ;;  %v2312_v10 = vld [vmem:[#allocation10 + $0xec] ss:$16 sps:$4 sm:$0xff]  }
 0x58c   :  { %1568 = vmatpush1.bf16.msra.mxu1 %v3077_v5  ;;  %1609 = vmatpush1.bf16.msra.mxu0 %v2713_v11 }
 0x58d   :  { %1569 = vmatprep.subr.bf16.mxu1 %v3081_v6  ;;  %1610 = vmatprep.subr.bf16.mxu0 %v2716_v12 }
 0x590   :  { %1570 = vmatpush1.bf16.msra.mxu1 %v3085_v7  ;;  %1611 = vmatpush1.bf16.msra.mxu0 %v2721_v13 }
 0x591   :  { %1571 = vmatprep.subr.bf16.mxu1 %v3089_v8  ;;  %1612 = vmatprep.subr.bf16.mxu0 %v2724_v14 }
 0x594   :  { %1572 = vmatpush1.bf16.msra.mxu1 %v3093_v9  ;;  %1613 = vmatpush1.bf16.msra.mxu0 %v2729_v15  ;;  %v3224_v15 = vld [vmem:[#allocation33_spill] sm:$0xff] }
 0x595   :  { %1668 = vmatprep.subr.bf16.mxu1 %v3035_v46  ;;  %1709 = vmatprep.subr.bf16.mxu0 %v2312_v10 }
 0x637   :  { %v1480_v11 = vpop.f32.mrf.mxu1  ;;  %v1521_v12 = vpop.f32.mrf.mxu0 }
 0x638   :  { %v1528_v13 = vadd.f32 %v1480_v11, %v3222_v17  ;;  %v1530_v59 = vadd.f32 %v1521_v12, %v3225_v43 }
 0x639   :  { %v1482_v54 = vpop.f32.mrf.mxu1  ;;  %v1523_v22 = vpop.f32.mrf.mxu0 }
 0x63a   :  { %v1965_v19 = vmul.f32 -1.442695, %v1528_v13  ;;  %v1529_v50 = vadd.f32 %v1482_v54, %v3223_v48  ;;  %v1531_v46 = vadd.f32 %v1523_v22, %v3224_v15  ;;  %v3228_v13 = vld [vmem:[#allocation37_spill] sm:$0xff]  ;;  %v3229_v54 = vld [vmem:[#allocation35_spill] sm:$0xff] }
 0x63b   :  { %v1484_v14 = vpop.f32.mrf.mxu1  ;;  %v1525_v52 = vpop.f32.mrf.mxu0 }
 0x63c   :  { %2216 = vpow2.f32 %v1965_v19  ;;  %v1966_v53 = vmul.f32 -1.442695, %v1529_v50  ;;  %v1967_v45 = vmul.f32 -1.442695, %v1531_v46 }
 0x63d   :  { %v1485_v55 = vpop.f32.mrf.mxu1  ;;  %v1526_v57 = vpop.f32.mrf.mxu0 }
 0x63e   :  { %2218 = vpow2.f32 %v1966_v53 }
 0x63f   :  { %2220 = vtanh.f32 %v1530_v59 }
 0x640   :  { %2222 = vpow2.f32 %v1967_v45 }
 0x649   :  { %v2217_v44 = vpop.eup %2216 }
 0x64a   :  { %v1535_v21 = vadd.f32 1.0, %v2217_v44 }
 0x64b   :  { %v2219_v60 = vpop.eup %2218 }
 0x64c   :  { %2224 = vrcp.f32 %v1535_v21  ;;  %v1541_v0 = vadd.f32 1.0, %v2219_v60  ;;  %v2221_v23 = vpop.eup %2220 }
 0x64d   :  { %v2223_v27 = vpop.eup %2222 }
 0x64e   :  { %2226 = vrcp.f32 %v1541_v0  ;;  %v1548_v33 = vadd.f32 1.0, %v2223_v27 }
 0x650   :  { %2228 = vrcp.f32 %v1548_v33 }
 0x659   :  { %v2225_v29 = vpop.eup %2224 }
 0x65a   :  { %v1552_v32 = vmul.f32 %v2225_v29, %v2221_v23  ;;  %v3230_v29 = vld [vmem:[#allocation38_spill] sm:$0xff] }
 0x65b   :  { %v2227_v62 = vpop.eup %2226 }
 0x65c   :  { %v1551_v34 = vmul.f32 %v2227_v62, %v3044_v25  ;;  %v2325_v25 = vld [vmem:[#allocation10 + $0x28] ss:$16 sps:$4 sm:$0xff]  }
 0x65d   :  { %v2229_v42 = vpop.eup %2228 }
 0x65e   :  { %v3103_v56 = vadd.f32 %v1552_v32, %v1551_v34 }
 0x660   :  { %2230 = vtanh.f32 %v3103_v56 }
 0x66d   :  { %v2231_v30 = vpop.eup %2230 }
 0x66e   :  { %v1555_v58 = vmul.f32 %v2231_v30, %v2229_v42 }
 0x670   :  { %v1556_v26 = vpack.c.bf16 %v1555_v58, %v1555_v58  ;;  %1783 = vst [vmem:[#allocation12 + $0x28] sm:$0xff] %v1555_v58 }
 0x672   :  { %1590 = vmatmul.mubr.bf16.vlgmr.msra.gmra.mxu1 %v1556_v26  ;;  %1631 = vmatmul.mubr.bf16.vlgmr.msra.gmra.mxu0 %v1556_v26 }
 0x673   :  { %1669 = vmatpush1.bf16.msra.mxu1 %v2991_v37  ;;  %1710 = vmatpush1.bf16.msra.mxu0 %v2313_v18  ;;  %v2317_v37 = vld [vmem:[#allocation10 + $0xa8] ss:$16 sps:$4 sm:$0xff]  }
 0x674   :  { %1670 = vmatprep.subr.bf16.mxu1 %v2995_v36  ;;  %1711 = vmatprep.subr.bf16.mxu0 %v2314_v28  ;;  %v2318_v36 = vld [vmem:[#allocation10 + $0x8c] ss:$16 sps:$4 sm:$0xff]  }
 0x675   :  { %1700 = vmatprep.mubr.bf16.mxu1 %v3214_v49  ;;  %1741 = vmatprep.mubr.bf16.mxu0 %v3214_v49  ;;  %v2320_v49 = vld [vmem:[#allocation10 + $0x6c] ss:$16 sps:$4 sm:$0xff]  }
 0x677   :  { %1671 = vmatpush1.bf16.msra.mxu1 %v3001_v63  ;;  %1712 = vmatpush1.bf16.msra.mxu0 %v2315_v51  ;;  %v2321_v63 = vld [vmem:[#allocation10 + $0x68] ss:$16 sps:$4 sm:$0xff]   ;;  %v1912_v51 = vmul.f32 -1.442695, %v2842_v20 }
 0x678   :  { %1672 = vmatprep.subr.bf16.mxu1 %v3005_v38  ;;  %1713 = vmatprep.subr.bf16.mxu0 %v2316_v40  ;;  %v2322_v38 = vld [vmem:[#allocation10 + $0x4c] ss:$16 sps:$4 sm:$0xff]   ;;  %v1910_v40 = vmul.f32 -1.442695, %v2844_v31 }
 0x67b   :  { %1673 = vmatpush1.bf16.msra.mxu1 %v3009_v39  ;;  %1714 = vmatpush1.bf16.msra.mxu0 %v2317_v37  ;;  %v2323_v39 = vld [vmem:[#allocation10 + $0x48] ss:$16 sps:$4 sm:$0xff]  }
 0x67c   :  { %1674 = vmatprep.subr.bf16.mxu1 %v3013_v41  ;;  %1715 = vmatprep.subr.bf16.mxu0 %v2318_v36  ;;  %v2324_v41 = vld [vmem:[#allocation10 + $0x2c] ss:$16 sps:$4 sm:$0xff]  }
 0x67d   :  { %v3232_v37 = vld [vmem:[#allocation42_spill] sm:$0xff] }
 0x67e   :  { %v1913_v36 = vmul.f32 -1.442695, %v3232_v37 }
 0x67f   :  { %1675 = vmatpush1.bf16.msra.mxu1 %v3061_v1  ;;  %1716 = vmatpush1.bf16.msra.mxu0 %v2319_v61  ;;  %v3226_v1 = vld [vmem:[#allocation34_spill] sm:$0xff]  ;;  %v3233_v61 = vld [vmem:[#allocation43_spill] sm:$0xff] }
 0x680   :  { %1676 = vmatprep.subr.bf16.mxu1 %v3065_v2  ;;  %1717 = vmatprep.subr.bf16.mxu0 %v2320_v49  ;;  %v1911_v49 = vmul.f32 -1.442695, %v3233_v61 }
 0x683   :  { %1677 = vmatpush1.bf16.msra.mxu1 %v3069_v3  ;;  %1718 = vmatpush1.bf16.msra.mxu0 %v2321_v63  ;;  %v3234_v63 = vld [vmem:[#allocation44_spill] sm:$0xff] }
 0x684   :  { %1678 = vmatprep.subr.bf16.mxu1 %v3073_v4  ;;  %1719 = vmatprep.subr.bf16.mxu0 %v2322_v38  ;;  %v1916_v38 = vmul.f32 -1.442695, %v3234_v63 }
 0x687   :  { %1679 = vmatpush1.bf16.msra.mxu1 %v3077_v5  ;;  %1720 = vmatpush1.bf16.msra.mxu0 %v2323_v39  ;;  %v3235_v39 = vld [vmem:[#allocation41_spill] sm:$0xff] }
 0x688   :  { %1680 = vmatprep.subr.bf16.mxu1 %v3081_v6  ;;  %1721 = vmatprep.subr.bf16.mxu0 %v2324_v41  ;;  %v3227_v6 = vld [vmem:[#allocation36_spill] sm:$0xff] }
 0x68b   :  { %1681 = vmatpush1.bf16.msra.mxu1 %v3085_v7  ;;  %1722 = vmatpush1.bf16.msra.mxu0 %v2325_v25  ;;  %v3236_v25 = vld [vmem:[#allocation45_spill] sm:$0xff] }
 0x68c   :  { %1682 = vmatprep.subr.bf16.mxu1 %v3089_v8  ;;  %1723 = vmatprep.subr.bf16.mxu0 %v2326_v35  ;;  %v1914_v35 = vmul.f32 -1.442695, %v3236_v25 }
 0x68f   :  { %1683 = vmatpush1.bf16.msra.mxu1 %v3093_v9  ;;  %1724 = vmatpush1.bf16.msra.mxu0 %v2327_v47  ;;  %v3237_v47 = vld [vmem:[#allocation46_spill] sm:$0xff] }
 0x732   :  { %v1591_v16 = vpop.f32.mrf.mxu1  ;;  %v1632_v24 = vpop.f32.mrf.mxu0 }
 0x733   :  { %v1639_v2 = vadd.f32 %v1591_v16, %v3226_v1  ;;  %v1641_v22 = vadd.f32 %v1632_v24, %v3229_v54  ;;  %v1917_v16 = vmul.f32 -1.442695, %v3237_v47  ;;  %v3238_v24 = vld [vmem:[#allocation39_spill] sm:$0xff] }
 0x734   :  { %v1593_v3 = vpop.f32.mrf.mxu1  ;;  %v1634_v4 = vpop.f32.mrf.mxu0 }
 0x735   :  { %v1968_v5 = vmul.f32 -1.442695, %v1639_v2  ;;  %v1640_v10 = vadd.f32 %v1593_v3, %v3227_v6  ;;  %v1642_v9 = vadd.f32 %v1634_v4, %v3228_v13  ;;  %v3239_v2 = vld [vmem:[#allocation47_spill] sm:$0xff] }
 0x736   :  { %v1595_v7 = vpop.f32.mrf.mxu1  ;;  %v1636_v11 = vpop.f32.mrf.mxu0  ;;  %v1915_v3 = vmul.f32 -1.442695, %v3239_v2 }
 0x737   :  { %2232 = vpow2.f32 %v1968_v5  ;;  %v1969_v12 = vmul.f32 -1.442695, %v1640_v10  ;;  %v1970_v19 = vmul.f32 -1.442695, %v1642_v9 }
 0x738   :  { %v1596_v8 = vpop.f32.mrf.mxu1  ;;  %v1637_v17 = vpop.f32.mrf.mxu0 }
 0x739   :  { %2234 = vpow2.f32 %v1969_v12 }
 0x73a   :  { %2236 = vtanh.f32 %v1641_v22 }
 0x73b   :  { %2238 = vpow2.f32 %v1970_v19 }
 0x744   :  { %v2233_v48 = vpop.eup %2232 }
 0x745   :  { %v1646_v50 = vadd.f32 1.0, %v2233_v48 }
 0x746   :  { %v2235_v14 = vpop.eup %2234 }
 0x747   :  { %2240 = vrcp.f32 %v1646_v50  ;;  %v1652_v52 = vadd.f32 1.0, %v2235_v14  ;;  %v2237_v53 = vpop.eup %2236 }
 0x748   :  { %v2239_v55 = vpop.eup %2238 }
 0x749   :  { %2242 = vrcp.f32 %v1652_v52  ;;  %v1659_v43 = vadd.f32 1.0, %v2239_v55 }
 0x74b   :  { %2244 = vrcp.f32 %v1659_v43 }
 0x754   :  { %v2241_v57 = vpop.eup %2240 }
 0x755   :  { %v1663_v15 = vmul.f32 %v2241_v57, %v2237_v53 }
 0x756   :  { %v2243_v46 = vpop.eup %2242 }
 0x757   :  { %v1662_v59 = vmul.f32 %v2243_v46, %v3103_v56  ;;  %v3231_v56 = vld [vmem:[#allocation40_spill] sm:$0xff] }
 0x758   :  { %v2245_v44 = vpop.eup %2244 }
 0x759   :  { %v3128_v45 = vadd.f32 %v1663_v15, %v1662_v59 }
 0x75b   :  { %2246 = vtanh.f32 %v3128_v45 }
 0x768   :  { %v2247_v21 = vpop.eup %2246 }
 0x769   :  { %v1666_v60 = vmul.f32 %v2247_v21, %v2245_v44 }
 0x76b   :  { %v1667_v0 = vpack.c.bf16 %v1666_v60, %v1666_v60  ;;  %1784 = vst [vmem:[#allocation12 + $0x30] sm:$0xff] %v1666_v60 }
 0x76d   :  { %1701 = vmatmul.mubr.bf16.vlgmr.msra.gmra.mxu1 %v1667_v0  ;;  %1742 = vmatmul.mubr.bf16.vlgmr.msra.gmra.mxu0 %v1667_v0 }
 0x82d   :  { %v1702_v23 = vpop.f32.mrf.mxu1  ;;  %v1743_v27 = vpop.f32.mrf.mxu0 }
 0x82e   :  { %v1750_v32 = vadd.f32 %v1702_v23, %v3230_v29  ;;  %v1752_v20 = vadd.f32 %v1743_v27, %v3238_v24 }
 0x82f   :  { %v1704_v62 = vpop.f32.mrf.mxu1  ;;  %v1745_v33 = vpop.f32.mrf.mxu0 }
 0x830   :  { %v1971_v34 = vmul.f32 -1.442695, %v1750_v32  ;;  %v1751_v42 = vadd.f32 %v1704_v62, %v3231_v56  ;;  %v1753_v41 = vadd.f32 %v1745_v33, %v3235_v39 }
 0x831   :  { %v1706_v30 = vpop.f32.mrf.mxu1  ;;  %v1747_v58 = vpop.f32.mrf.mxu0 }
 0x832   :  { %2248 = vpow2.f32 %v1971_v34  ;;  %v1972_v26 = vmul.f32 -1.442695, %v1751_v42  ;;  %v1973_v31 = vmul.f32 -1.442695, %v1753_v41 }
 0x833   :  { %v1707_v18 = vpop.f32.mrf.mxu1  ;;  %v1748_v28 = vpop.f32.mrf.mxu0 }
 0x834   :  { %2250 = vpow2.f32 %v1972_v26 }
 0x835   :  { %2252 = vpow2.f32 %v1912_v51 }
 0x836   :  { %2254 = vpow2.f32 %v1910_v40 }
 0x837   :  { %2256 = vpow2.f32 %v1913_v36 }
 0x838   :  { %2258 = vpow2.f32 %v1911_v49 }
 0x839   :  { %2260 = vpow2.f32 %v1916_v38 }
 0x83a   :  { %2262 = vpow2.f32 %v1914_v35 }
 0x83b   :  { %2264 = vpow2.f32 %v1917_v16 }
 0x83c   :  { %2266 = vtanh.f32 %v1752_v20 }
 0x83d   :  { %2268 = vpow2.f32 %v1973_v31 }
 0x83f   :  { %v2249_v1 = vpop.eup %2248 }
 0x840   :  { %v1757_v4 = vadd.f32 1.0, %v2249_v1 }
 0x841   :  { %v2251_v5 = vpop.eup %2250 }
 0x842   :  { %2270 = vrcp.f32 %v1757_v4  ;;  %v1763_v6 = vadd.f32 1.0, %v2251_v5  ;;  %v2253_v10 = vpop.eup %2252 }
 0x843   :  { %2272 = vpow2.f32 %v1915_v3  ;;  %v2255_v7 = vpop.eup %2254  ;;  %v674_v13 = vadd.f32 1.0, %v2253_v10 }
 0x844   :  { %2274 = vrcp.f32 %v1763_v6  ;;  %v2257_v11 = vpop.eup %2256  ;;  %v672_v54 = vadd.f32 1.0, %v2255_v7 }
 0x845   :  { %v2259_v12 = vpop.eup %2258  ;;  %v675_v19 = vadd.f32 1.0, %v2257_v11  ;;  %2276 = vrcp.f32 %v674_v13 }
 0x846   :  { %v2261_v8 = vpop.eup %2260  ;;  %v673_v50 = vadd.f32 1.0, %v2259_v12  ;;  %2278 = vrcp.f32 %v672_v54 }
 0x847   :  { %v2263_v17 = vpop.eup %2262  ;;  %v678_v52 = vadd.f32 1.0, %v2261_v8  ;;  %2280 = vrcp.f32 %v675_v19 }
 0x848   :  { %v2265_v9 = vpop.eup %2264  ;;  %v676_v55 = vadd.f32 1.0, %v2263_v17  ;;  %2282 = vrcp.f32 %v673_v50 }
 0x849   :  { %v2267_v22 = vpop.eup %2266  ;;  %2284 = vrcp.f32 %v678_v52  ;;  %v679_v44 = vadd.f32 1.0, %v2265_v9 }
 0x84a   :  { %v2269_v48 = vpop.eup %2268  ;;  %2286 = vrcp.f32 %v676_v55 }
 0x84b   :  { %v1770_v46 = vadd.f32 1.0, %v2269_v48 }
 0x84d   :  { %2288 = vrcp.f32 %v1770_v46 }
 0x84f   :  { %v2271_v14 = vpop.eup %2270 }
 0x850   :  { %v2273_v53 = vpop.eup %2272  ;;  %v1774_v57 = vmul.f32 %v2271_v14, %v2267_v22 }
 0x851   :  { %v2275_v15 = vpop.eup %2274  ;;  %v677_v59 = vadd.f32 1.0, %v2273_v53 }
 0x852   :  { %v1773_v43 = vmul.f32 %v2275_v15, %v3128_v45 }
 0x854   :  { %v1775_v21 = vadd.f32 %v1774_v57, %v1773_v43 }
 0x856   :  { %2290 = vtanh.f32 %v1775_v21  ;;  %1787 = vst [vmem:[#allocation15] sm:$0xff] %v1775_v21 }
 0x857   :  { %2292 = vrcp.f32 %v677_v59 }
 0x858   :  { %2439 = shalt.err (!%p2436_p1)
}
 0x859   :  { %1847 = dma.vmem_to_hbm [thread:$0]  %s1845_s16, 128, %s3186_s9, [#allocation16]   ;;  %2294 = vrcp.f32 %v679_v44  ;;  %v2277_v45 = vpop.eup %2276 }
 0x85a   :  { %v2279_v60 = vpop.eup %2278  ;;  %s2533_s20 = smov [#allocation12]   ;;  %s2534_s22 = smov [#allocation14]  }
 0x85b   :  { %v2281_v0 = vpop.eup %2280  ;;  %s1821_s21 = sshll.u32 %s2533_s20, 4  ;;  %s1834_s23 = sshll.u32 %s2534_s22, 4  ;;  %s3147_s21 = int_to_ptr.vmem [resolvable:$true] %s1821_s21  ;;  %s3149_s23 = int_to_ptr.vmem [resolvable:$true] %s1834_s23 }
 0x85c   :  { %v2283_v23 = vpop.eup %2282  ;;  %s2535_s1 = smov [#allocation11]   ;;  %s2448_s9 = scalar_lea.vmem %s3147_s21, 1024 }
 0x85d   :  { %v2285_v27 = vpop.eup %2284  ;;  %s1809_s24 = sshll.u32 %s2535_s1, 4  ;;  %p2449_p2 = scmp.ne.s32.totalorder %s3147_s21, %s2448_s9  ;;  %s3151_s24 = int_to_ptr.vmem [resolvable:$true] %s1809_s24 }
 0x85e   :  { %v2287_v29 = vpop.eup %2286  ;;  %p2453_p3 = scmp.lt.s32.totalorder %s3147_s21, %s3147_s21  ;;  %p2454_p4 = scmp.lt.s32.totalorder %s2448_s9, %s2448_s9 }
 0x85f   :  { %v2289_v32 = vpop.eup %2288 }
 0x860   :  { %p2455_p5 = por %p2454_p4, %p2453_p3 }
 0x862   :  { %p2456_p6 = pnand %p2455_p5, %p2449_p2 }
 0x863   :  { %v2291_v62 = vpop.eup %2290 }
 0x864   :  { %v2293_v33 = vpop.eup %2292  ;;  %v1777_v34 = vmul.f32 %v2291_v62, %v2289_v32  ;;  %v1788_v56 = vmul.f32 %v2291_v62, %v2279_v60  ;;  %v1789_v42 = vmul.f32 %v2291_v62, %v2283_v23  ;;  %v1790_v30 = vmul.f32 %v2291_v62, %v2277_v45 }
 0x865   :  { %v1791_v26 = vmul.f32 %v2291_v62, %v2281_v0  ;;  %v1792_v18 = vmul.f32 %v2291_v62, %v2287_v29  ;;  %v1793_v28 = vmul.f32 %v2293_v33, %v2291_v62  ;;  %v1794_v51 = vmul.f32 %v2291_v62, %v2285_v27 }
 0x866   :  { %v2295_v58 = vpop.eup %2294  ;;  %1785 = vst [vmem:[#allocation12 + $0x38] sm:$0xff] %v1777_v34  ;;  %1786 = vst [vmem:[#allocation14] sm:$0xff] %v1777_v34 }
 0x867   :  { %v1795_v40 = vmul.f32 %v2295_v58, %v2291_v62  ;;  %1796 = vst [vmem:[#allocation11] sm:$0xff] %v1788_v56  ;;  %1797 = vst [vmem:[#allocation11 + $0x8] sm:$0xff] %v1789_v42 }
 0x868   :  { %1798 = vst [vmem:[#allocation11 + $0x10] sm:$0xff] %v1790_v30 }
 0x869   :  { %2459 = shalt.err (!%p2456_p6)
}
 0x86a   :  { %s2536_s25 = smov 128   ;;  %s2537_s26 = smov 8   ;;  %1799 = vst [vmem:[#allocation11 + $0x18] sm:$0xff] %v1791_v26  ;;  %1800 = vst [vmem:[#allocation11 + $0x20] sm:$0xff] %v1792_v18 }
 0x86b   :  { %1827 = dma.vmem_to_hbm [thread:$0]  %s3147_s21, 1024, %s3184_s7, [#allocation13], %s2536_s25, %s2536_s25, %s2537_s26   ;;  %1801 = vst [vmem:[#allocation11 + $0x28] sm:$0xff] %v1793_v28  ;;  %1802 = vst [vmem:[#allocation11 + $0x30] sm:$0xff] %v1794_v51 }
 0x86c   :  { %1803 = vst [vmem:[#allocation11 + $0x38] sm:$0xff] %v1795_v40  ;;  %s2468_s3 = scalar_lea.vmem %s3149_s23, 128  ;;  %p2473_p8 = scmp.lt.s32.totalorder %s3149_s23, %s3149_s23 }
 0x86d   :  { %p2469_p7 = scmp.ne.s32.totalorder %s3149_s23, %s2468_s3  ;;  %p2474_p9 = scmp.lt.s32.totalorder %s2468_s3, %s2468_s3 }
 0x86f   :  { %p2475_p10 = por %p2474_p9, %p2473_p8 }
 0x871   :  { %p2476_p11 = pnand %p2475_p10, %p2469_p7 }
 0x873   :  { %2479 = shalt.err (!%p2476_p11)
}
 0x874   :  { %1837 = dma.vmem_to_hbm [thread:$0]  %s3149_s23, 128, %s3185_s8, [#allocation13]  }
 0x875   :  { %s2488_s7 = scalar_lea.vmem %s3151_s24, 1024  ;;  %p2493_p13 = scmp.lt.s32.totalorder %s3151_s24, %s3151_s24 }
 0x876   :  { %p2489_p12 = scmp.ne.s32.totalorder %s3151_s24, %s2488_s7  ;;  %p2494_p0 = scmp.lt.s32.totalorder %s2488_s7, %s2488_s7 }
 0x878   :  { %p2495_p1 = por %p2494_p0, %p2493_p13 }
 0x87a   :  { %p2496_p2 = pnand %p2495_p1, %p2489_p12 }
 0x87c   :  { %2499 = shalt.err (!%p2496_p2)
}
 0x87d   :  { %1815 = dma.vmem_to_hbm [thread:$0]  %s3151_s24, 1024, %s3183_s6, [#allocation4], %s2536_s25, %s2536_s25, %s2537_s26  }
 0x87e   :  { %2514 = dma.done.wait [#allocation4], 1024  }
 0x87f   :  { %2515 = vsyncadd [#allocation4], 4294966272 }
 0x880   :  { %2516 = dma.done.wait [#allocation13], 1152  }
 0x881   :  { %2517 = vsyncadd [#allocation13], 4294966144 }
 0x882   :  { %2518 = dma.done.wait [#allocation16], 128  }
 0x883   :  { %2519 = vsyncadd [#allocation16], 4294967168 }
 0x884   :  { %1860 = vsyncpa [#allocation3], 1 }
 0x885   :  { %1861 = vsyncpa [#allocation6], 1 }
 0x886   :  { %1862 = vsyncpa [#allocation9], 1 }
 0x887   :  { %1863 = vsyncpa [#allocation4], 1 }
 0x888   :  { %1864 = vsyncpa [#allocation13], 1 }
 0x889   :  { %1865 = vsyncpa [#allocation16], 1 }

</bundles_post_ra>
